<compile_context>
chip_gen: v7x
topology: tpu7x:2x2x1
jax: 0.10.0
libtpu: 0.0.40
codegen_flags: <defaults>
</compile_context>

<pallas_src>
import math

import jax
import jax.numpy as jnp
from jax import lax
from jax.experimental import pallas as pl
from jax.experimental.pallas import tpu as pltpu


# ---------------------------------------------------------------------------
# Kernel
# ---------------------------------------------------------------------------
def _layer_norm(x, alpha, bias):
    """torch-style Norm: alpha*(x-mean)/(std_unbiased + eps) + bias (exact)."""
    d = x.shape[-1]
    mu = jnp.mean(x, axis=-1, keepdims=True)
    xc = x - mu
    var = jnp.sum(xc * xc, axis=-1, keepdims=True) * (1.0 / (d - 1))  # unbiased
    inv_std = 1.0 / (jnp.sqrt(var) + 1e-6)
    return alpha * (xc * inv_std) + bias


def make_encoding_block_kernel(S, D, H, F, N):
    dk = D // H

    def kernel(q_ref, k_ref, mask_ref, normp_ref,
               wqkv_ref, bqkv_ref, wout_ref, bout_ref,
               w1_ref, b1_ref, w2_ref, b2_ref,
               fa_ref, fb_ref, out_ref):
        f32 = jnp.float32
        q = q_ref[...].astype(f32)          # (S, D) — batch dim squeezed by spec
        kx = k_ref[...].astype(f32)         # (S, D)
        addmask = mask_ref[...]             # (S, S) additive f32 (-1e9 / 0)

        # k is constant across layers: hoist its Norm statistics once.
        k_mu = jnp.mean(kx, axis=-1, keepdims=True)
        kc = kx - k_mu
        k_var = jnp.sum(kc * kc, axis=-1, keepdims=True) * (1.0 / (D - 1))
        kcn = kc * (1.0 / (jnp.sqrt(k_var) + 1e-6))   # normalized, pre-affine

        for l in range(N):   # static unroll; all layer weights resident in VMEM
            # --- pre-attention norms ---
            q2 = _layer_norm(q, normp_ref[l, 0], normp_ref[l, 1])
            k2 = normp_ref[l, 2] * kcn + normp_ref[l, 3]   # per-layer affine only

            # --- projections (Wq / bq pre-scaled by 1/sqrt(dk) in the wrapper)
            Q = jnp.dot(q2, wqkv_ref[l, 0], preferred_element_type=f32) + bqkv_ref[l, 0]
            K = jnp.dot(k2, wqkv_ref[l, 1], preferred_element_type=f32) + bqkv_ref[l, 1]
            V = jnp.dot(k2, wqkv_ref[l, 2], preferred_element_type=f32) + bqkv_ref[l, 2]

            # --- multi-head attention: per-head d_k contractions (no redundant
            # MXU work, no (H,M,D) temporaries).  The output projection is
            # accumulated per head: concat @ Wout == sum_h oh @ Wout_rows[h],
            # because Wout rows are head-blocked -> no lane concat needed.
            attn_out = jnp.zeros((S, D), f32)
            for h in range(H):
                sl = slice(h * dk, (h + 1) * dk)
                Qh, Kh, Vh = Q[:, sl], K[:, sl], V[:, sl]
                s = lax.dot_general(Qh, Kh, (((1,), (1,)), ((), ())),
                                    preferred_element_type=f32) + addmask
                s = s - jnp.max(s, axis=-1, keepdims=True)
                p = jnp.exp(s)
                p = p * pl.reciprocal(jnp.sum(p, axis=-1, keepdims=True),
                                      approx=True)
                oh = jnp.dot(p, Vh, preferred_element_type=f32)       # (S, dk)
                attn_out = attn_out + jnp.dot(oh, wout_ref[l, h],
                                              preferred_element_type=f32)
            q = q + attn_out + bout_ref[l]

            # --- feed forward ---
            q2 = _layer_norm(q, normp_ref[l, 4], normp_ref[l, 5])
            h1 = jnp.maximum(
                jnp.dot(q2, w1_ref[l], preferred_element_type=f32) + b1_ref[l], 0.0)
            q = q + jnp.dot(h1, w2_ref[l], preferred_element_type=f32) + b2_ref[l]

        # --- final Norm folded into the same kernel ---
        out_ref[...] = _layer_norm(q, fa_ref[...], fb_ref[...]).astype(out_ref.dtype)

    return kernel


# ---------------------------------------------------------------------------
# Wrapper
# ---------------------------------------------------------------------------
def _stack_layer_params(layers, H):
    """Stack per-layer params into (N, ...) tensors; fold 1/sqrt(dk) into Wq/bq;
    split Wout into head-blocked rows (done here in XLA, free for the kernel)."""
    N = len(layers)
    D = layers[0]["aw"].shape[-1]
    dk = D // H
    s = 1.0 / math.sqrt(dk)
    normp = jnp.stack([l["normp"] for l in layers])[:, :, None, :]    # (N,6,1,D)
    aw = jnp.stack([l["aw"] for l in layers])                          # (N,4,D,D)
    ab = jnp.stack([l["ab"] for l in layers])                          # (N,4,D)
    wqkv = aw[:, :3].at[:, 0].multiply(s)                              # (N,3,D,D)
    bqkv = (ab[:, :3].at[:, 0].multiply(s))[:, :, None, :]             # (N,3,1,D)
    wout = aw[:, 3].reshape(N, H, dk, D)                               # (N,H,dk,D)
    bout = ab[:, 3][:, None, :]                                        # (N,1,D)
    w1 = jnp.stack([l["w1"] for l in layers])                          # (N,D,F)
    b1 = jnp.stack([l["b1"] for l in layers])                          # (N,1,F)
    w2 = jnp.stack([l["w2"] for l in layers])                          # (N,F,D)
    b2 = jnp.stack([l["b2"] for l in layers])                          # (N,1,D)
    return normp, wqkv, bqkv, wout, bout, w1, b1, w2, b2


def _resident_spec(arr):
    """Full-array block, constant block index => DMA'd once, kept resident."""
    nd = arr.ndim
    return pl.BlockSpec(arr.shape, lambda b, _nd=nd: (0,) * _nd)


def encoding_block_pallas(q, k, attn_mask, params, *, H):
    """One fused pallas_call: N encoder layers + final Norm; grid over batch."""
    B, S, D = q.shape
    layers = params["layers"]
    N = len(layers)
    F = layers[0]["w1"].shape[-1]

    stacked = _stack_layer_params(layers, H)
    fa = params["norm_alpha"].reshape(1, D)
    fb = params["norm_bias"].reshape(1, D)
    weights = stacked + (fa, fb)

    # Per-batch additive f32 mask: -1e9 where attn_mask is set, 0 elsewhere.
    add_mask = jnp.where(attn_mask != 0, jnp.float32(-1e9), jnp.float32(0.0))

    kernel = make_encoding_block_kernel(S, D, H, F, N)
    # Grid over the batch (marked "parallel" -> shards across both TCs on v7x).
    # The leading dim of q/k/mask/out is squeezed by the BlockSpec so the
    # kernel works on clean 2-D (S, D) tiles with no in-kernel reshapes.
    return pl.pallas_call(
        kernel,
        grid=(B,),
        in_specs=[
            pl.BlockSpec((None, S, D), lambda b: (b, 0, 0)),    # q
            pl.BlockSpec((None, S, D), lambda b: (b, 0, 0)),    # k
            pl.BlockSpec((None, S, S), lambda b: (b, 0, 0)),    # additive mask
        ] + [_resident_spec(w) for w in weights],
        out_specs=pl.BlockSpec((None, S, D), lambda b: (b, 0, 0)),
        out_shape=jax.ShapeDtypeStruct((B, S, D), q.dtype),
        compiler_params=pltpu.CompilerParams(
            dimension_semantics=("parallel",),
            vmem_limit_bytes=32 * 1024 * 1024),
    )(q, k, add_mask, *weights)


# ---------------------------------------------------------------------------
# Pure-JAX reference (for validation)
# ---------------------------------------------------------------------------
def ref_norm(x, alpha, bias):
    mu = jnp.mean(x, axis=-1, keepdims=True)
    std = jnp.std(x, axis=-1, keepdims=True, ddof=1)
    return alpha * (x - mu) / (std + 1e-6) + bias


def ref_encoder_layer(q, k, mask, p, H):
    B, S, D = q.shape
    dk = D // H
    aw, ab, npar = p["aw"], p["ab"], p["normp"]
    q2 = ref_norm(q, npar[0], npar[1])
    k2 = ref_norm(k, npar[2], npar[3])
    Q = (q2 @ aw[0] + ab[0]).reshape(B, S, H, dk).transpose(0, 2, 1, 3)
    K = (k2 @ aw[1] + ab[1]).reshape(B, S, H, dk).transpose(0, 2, 1, 3)
    V = (k2 @ aw[2] + ab[2]).reshape(B, S, H, dk).transpose(0, 2, 1, 3)
    score = jnp.einsum("bhqd,bhkd->bhqk", Q, K) / math.sqrt(dk)
    score = jnp.where(mask[:, None] != 0, -1e9, score)
    prob = jax.nn.softmax(score, axis=-1)
    o = jnp.einsum("bhqk,bhkd->bhqd", prob, V)
    concat = o.transpose(0, 2, 1, 3).reshape(B, S, D)
    q = q + (concat @ aw[3] + ab[3])
    q2 = ref_norm(q, npar[4], npar[5])
    ff = jnp.maximum(q2 @ p["w1"] + p["b1"], 0.0) @ p["w2"] + p["b2"]
    return q + ff


def ref_encoding_block(q, k, mask, params, H):
    for layer in params["layers"]:
        q = ref_encoder_layer(q, k, mask, layer, H)
    return ref_norm(q, params["norm_alpha"], params["norm_bias"])


# ---------------------------------------------------------------------------
# Main
# ---------------------------------------------------------------------------
if __name__ == "__main__":
    B, S, D, H, F, N = 2, 8, 32, 4, 64, 2   # batch, seq, d_model, heads, d_ff, num_stack

    key = jax.random.PRNGKey(0)
    keys = jax.random.split(key, 8 * N + 5)
    ki = iter(keys)
    scale = 0.1

    # NOTE: `get_clones` deep-copies one initialized layer; distinct per-layer
    # weights are used here (as after training).
    layers = []
    for _ in range(N):
        alphas = 1.0 + scale * jax.random.normal(next(ki), (3, D), jnp.float32)
        biases = scale * jax.random.normal(next(ki), (3, D), jnp.float32)
        layers.append({
            # rows: alpha_q, bias_q, alpha_k, bias_k, alpha_q_attn, bias_q_attn
            "normp": jnp.stack([alphas[0], biases[0], alphas[1], biases[1],
                                alphas[2], biases[2]]),
            # [Wq, Wk, Wv, Wout] in (in, out) convention
            "aw": scale * jax.random.normal(next(ki), (4, D, D), jnp.float32),
            "ab": scale * jax.random.normal(next(ki), (4, D), jnp.float32),
            "w1": scale * jax.random.normal(next(ki), (D, F), jnp.float32),
            "b1": scale * jax.random.normal(next(ki), (1, F), jnp.float32),
            "w2": scale * jax.random.normal(next(ki), (F, D), jnp.float32),
            "b2": scale * jax.random.normal(next(ki), (1, D), jnp.float32),
        })
    params = {
        "layers": layers,
        "norm_alpha": 1.0 + scale * jax.random.normal(next(ki), (1, D), jnp.float32),
        "norm_bias": scale * jax.random.normal(next(ki), (1, D), jnp.float32),
    }

    q = jax.random.normal(next(ki), (B, S, D), jnp.float32)
    k = jax.random.normal(next(ki), (B, S, D), jnp.float32)
    mask = (jax.random.uniform(next(ki), (B, S, S)) < 0.2).astype(jnp.int32)
    # guarantee at least one unmasked key per query row
    mask = mask * (1 - jnp.eye(S, dtype=jnp.int32))[None]

    run = jax.jit(encoding_block_pallas, static_argnames=("H",))
    out = jax.block_until_ready(run(q, k, mask, params, H=H))

    ref = ref_encoding_block(q, k, mask, params, H)
    assert out.shape == (B, S, D)
    max_err = float(jnp.max(jnp.abs(out - ref)))
    # LayerNorm uses the exact reciprocal; only the softmax denominator uses the
    # EUP approx fast path, so the tolerance is comfortable.
    assert jnp.allclose(out, ref, rtol=2e-3, atol=2e-3), max_err

    print("KERNEL_OK")
</pallas_src>

<mosaic_0001>
module attributes {stable_mosaic.version = 11 : i64} {
  func.func @kernel(%arg0: i32, %arg1: memref<1x8x32xf32, #tpu.memory_space<vmem>>, %arg2: memref<1x8x32xf32, #tpu.memory_space<vmem>>, %arg3: memref<1x8x8xf32, #tpu.memory_space<vmem>>, %arg4: memref<2x6x1x32xf32, #tpu.memory_space<vmem>>, %arg5: memref<2x3x32x32xf32, #tpu.memory_space<vmem>>, %arg6: memref<2x3x1x32xf32, #tpu.memory_space<vmem>>, %arg7: memref<2x4x8x32xf32, #tpu.memory_space<vmem>>, %arg8: memref<2x1x32xf32, #tpu.memory_space<vmem>>, %arg9: memref<2x32x64xf32, #tpu.memory_space<vmem>>, %arg10: memref<2x1x64xf32, #tpu.memory_space<vmem>>, %arg11: memref<2x64x32xf32, #tpu.memory_space<vmem>>, %arg12: memref<2x1x32xf32, #tpu.memory_space<vmem>>, %arg13: memref<1x32xf32, #tpu.memory_space<vmem>>, %arg14: memref<1x32xf32, #tpu.memory_space<vmem>>, %arg15: memref<1x8x32xf32, #tpu.memory_space<vmem>>) attributes {dimension_semantics = [#tpu.dimension_semantics<parallel>], iteration_bounds = array<i64: 2>, scalar_prefetch = 0 : i64, scratch_operands = 0 : i64, tpu.core_type = #tpu.core_type<tc>, window_params = [{transform_indices = @transform_0, window_bounds = array<i64: 1, 8, 32>}, {transform_indices = @transform_1, window_bounds = array<i64: 1, 8, 32>}, {transform_indices = @transform_2, window_bounds = array<i64: 1, 8, 8>}, {pipeline_mode = #tpu.pipeline_mode<synchronous>, transform_indices = @transform_3, window_bounds = array<i64: 2, 6, 1, 32>}, {pipeline_mode = #tpu.pipeline_mode<synchronous>, transform_indices = @transform_4, window_bounds = array<i64: 2, 3, 32, 32>}, {pipeline_mode = #tpu.pipeline_mode<synchronous>, transform_indices = @transform_5, window_bounds = array<i64: 2, 3, 1, 32>}, {pipeline_mode = #tpu.pipeline_mode<synchronous>, transform_indices = @transform_6, window_bounds = array<i64: 2, 4, 8, 32>}, {pipeline_mode = #tpu.pipeline_mode<synchronous>, transform_indices = @transform_7, window_bounds = array<i64: 2, 1, 32>}, {pipeline_mode = #tpu.pipeline_mode<synchronous>, transform_indices = @transform_8, window_bounds = array<i64: 2, 32, 64>}, {pipeline_mode = #tpu.pipeline_mode<synchronous>, transform_indices = @transform_9, window_bounds = array<i64: 2, 1, 64>}, {pipeline_mode = #tpu.pipeline_mode<synchronous>, transform_indices = @transform_10, window_bounds = array<i64: 2, 64, 32>}, {pipeline_mode = #tpu.pipeline_mode<synchronous>, transform_indices = @transform_11, window_bounds = array<i64: 2, 1, 32>}, {pipeline_mode = #tpu.pipeline_mode<synchronous>, transform_indices = @transform_12, window_bounds = array<i64: 1, 32>}, {pipeline_mode = #tpu.pipeline_mode<synchronous>, transform_indices = @transform_13, window_bounds = array<i64: 1, 32>}, {transform_indices = @transform_14, window_bounds = array<i64: 1, 8, 32>}]} {
    %c0 = arith.constant 0 : index
    %c0_0 = arith.constant 0 : index
    %c0_1 = arith.constant 0 : index
    %0 = vector.load %arg1[%c0, %c0_0, %c0_1] : memref<1x8x32xf32, #tpu.memory_space<vmem>>, vector<1x8x32xf32>
    %1 = vector.shape_cast %0 : vector<1x8x32xf32> to vector<8x32xf32>
    %c0_2 = arith.constant 0 : index
    %c0_3 = arith.constant 0 : index
    %c0_4 = arith.constant 0 : index
    %2 = vector.load %arg2[%c0_2, %c0_3, %c0_4] : memref<1x8x32xf32, #tpu.memory_space<vmem>>, vector<1x8x32xf32>
    %3 = vector.shape_cast %2 : vector<1x8x32xf32> to vector<8x32xf32>
    %c0_5 = arith.constant 0 : index
    %c0_6 = arith.constant 0 : index
    %c0_7 = arith.constant 0 : index
    %4 = vector.load %arg3[%c0_5, %c0_6, %c0_7] : memref<1x8x8xf32, #tpu.memory_space<vmem>>, vector<1x8x8xf32>
    %5 = vector.shape_cast %4 : vector<1x8x8xf32> to vector<8x8xf32>
    %cst = arith.constant dense<0.000000e+00> : vector<8xf32>
    %6 = vector.multi_reduction <add>, %3, %cst [1] : vector<8x32xf32> to vector<8xf32>
    %7 = vector.shape_cast %6 : vector<8xf32> to vector<8x1xf32>
    %cst_8 = arith.constant 3.200000e+01 : f32
    %8 = vector.broadcast %cst_8 : f32 to vector<8x1xf32>
    %9 = arith.divf %7, %8 : vector<8x1xf32>
    %10 = vector.broadcast %9 : vector<8x1xf32> to vector<8x32xf32>
    %11 = arith.subf %3, %10 : vector<8x32xf32>
    %12 = arith.mulf %11, %11 : vector<8x32xf32>
    %cst_9 = arith.constant dense<0.000000e+00> : vector<8xf32>
    %13 = vector.multi_reduction <add>, %12, %cst_9 [1] : vector<8x32xf32> to vector<8xf32>
    %14 = vector.shape_cast %13 : vector<8xf32> to vector<8x1xf32>
    %cst_10 = arith.constant 0.0322580636 : f32
    %15 = vector.broadcast %cst_10 : f32 to vector<8x1xf32>
    %16 = arith.mulf %14, %15 : vector<8x1xf32>
    %17 = math.sqrt %16 : vector<8x1xf32>
    %cst_11 = arith.constant 9.99999997E-7 : f32
    %18 = vector.broadcast %cst_11 : f32 to vector<8x1xf32>
    %19 = arith.addf %17, %18 : vector<8x1xf32>
    %cst_12 = arith.constant 1.000000e+00 : f32
    %20 = vector.broadcast %cst_12 : f32 to vector<8x1xf32>
    %21 = arith.divf %20, %19 : vector<8x1xf32>
    %22 = vector.broadcast %21 : vector<8x1xf32> to vector<8x32xf32>
    %23 = arith.mulf %11, %22 : vector<8x32xf32>
    %c0_13 = arith.constant 0 : index
    %c0_14 = arith.constant 0 : index
    %c0_15 = arith.constant 0 : index
    %c0_16 = arith.constant 0 : index
    %24 = vector.load %arg4[%c0_13, %c0_14, %c0_15, %c0_16] : memref<2x6x1x32xf32, #tpu.memory_space<vmem>>, vector<1x1x1x32xf32>
    %25 = vector.shape_cast %24 : vector<1x1x1x32xf32> to vector<1x32xf32>
    %c0_17 = arith.constant 0 : index
    %c1 = arith.constant 1 : index
    %c0_18 = arith.constant 0 : index
    %c0_19 = arith.constant 0 : index
    %26 = vector.load %arg4[%c0_17, %c1, %c0_18, %c0_19] : memref<2x6x1x32xf32, #tpu.memory_space<vmem>>, vector<1x1x1x32xf32>
    %27 = vector.shape_cast %26 : vector<1x1x1x32xf32> to vector<1x32xf32>
    %cst_20 = arith.constant dense<0.000000e+00> : vector<8xf32>
    %28 = vector.multi_reduction <add>, %1, %cst_20 [1] : vector<8x32xf32> to vector<8xf32>
    %29 = vector.shape_cast %28 : vector<8xf32> to vector<8x1xf32>
    %cst_21 = arith.constant 3.200000e+01 : f32
    %30 = vector.broadcast %cst_21 : f32 to vector<8x1xf32>
    %31 = arith.divf %29, %30 : vector<8x1xf32>
    %32 = vector.broadcast %31 : vector<8x1xf32> to vector<8x32xf32>
    %33 = arith.subf %1, %32 : vector<8x32xf32>
    %34 = arith.mulf %33, %33 : vector<8x32xf32>
    %cst_22 = arith.constant dense<0.000000e+00> : vector<8xf32>
    %35 = vector.multi_reduction <add>, %34, %cst_22 [1] : vector<8x32xf32> to vector<8xf32>
    %36 = vector.shape_cast %35 : vector<8xf32> to vector<8x1xf32>
    %cst_23 = arith.constant 0.0322580636 : f32
    %37 = vector.broadcast %cst_23 : f32 to vector<8x1xf32>
    %38 = arith.mulf %36, %37 : vector<8x1xf32>
    %39 = math.sqrt %38 : vector<8x1xf32>
    %cst_24 = arith.constant 9.99999997E-7 : f32
    %40 = vector.broadcast %cst_24 : f32 to vector<8x1xf32>
    %41 = arith.addf %39, %40 : vector<8x1xf32>
    %cst_25 = arith.constant 1.000000e+00 : f32
    %42 = vector.broadcast %cst_25 : f32 to vector<8x1xf32>
    %43 = arith.divf %42, %41 : vector<8x1xf32>
    %44 = vector.broadcast %43 : vector<8x1xf32> to vector<8x32xf32>
    %45 = arith.mulf %33, %44 : vector<8x32xf32>
    %46 = vector.broadcast %25 : vector<1x32xf32> to vector<8x32xf32>
    %47 = arith.mulf %46, %45 : vector<8x32xf32>
    %48 = vector.broadcast %27 : vector<1x32xf32> to vector<8x32xf32>
    %49 = arith.addf %47, %48 : vector<8x32xf32>
    %c0_26 = arith.constant 0 : index
    %c2 = arith.constant 2 : index
    %c0_27 = arith.constant 0 : index
    %c0_28 = arith.constant 0 : index
    %50 = vector.load %arg4[%c0_26, %c2, %c0_27, %c0_28] : memref<2x6x1x32xf32, #tpu.memory_space<vmem>>, vector<1x1x1x32xf32>
    %51 = vector.shape_cast %50 : vector<1x1x1x32xf32> to vector<1x32xf32>
    %52 = vector.broadcast %51 : vector<1x32xf32> to vector<8x32xf32>
    %53 = arith.mulf %52, %23 : vector<8x32xf32>
    %c0_29 = arith.constant 0 : index
    %c3 = arith.constant 3 : index
    %c0_30 = arith.constant 0 : index
    %c0_31 = arith.constant 0 : index
    %54 = vector.load %arg4[%c0_29, %c3, %c0_30, %c0_31] : memref<2x6x1x32xf32, #tpu.memory_space<vmem>>, vector<1x1x1x32xf32>
    %55 = vector.shape_cast %54 : vector<1x1x1x32xf32> to vector<1x32xf32>
    %56 = vector.broadcast %55 : vector<1x32xf32> to vector<8x32xf32>
    %57 = arith.addf %53, %56 : vector<8x32xf32>
    %c0_32 = arith.constant 0 : index
    %c0_33 = arith.constant 0 : index
    %c0_34 = arith.constant 0 : index
    %c0_35 = arith.constant 0 : index
    %58 = vector.load %arg5[%c0_32, %c0_33, %c0_34, %c0_35] : memref<2x3x32x32xf32, #tpu.memory_space<vmem>>, vector<1x1x32x32xf32>
    %59 = vector.shape_cast %58 : vector<1x1x32x32xf32> to vector<32x32xf32>
    %cst_36 = arith.constant dense<0.000000e+00> : vector<8x32xf32>
    %60 = tpu.matmul %49, %59, %cst_36 {dimension_numbers = #tpu.dot_dimension_numbers<[1], [0], [0], [1], [0, 0, 1, 1], [], []>} : vector<8x32xf32>, vector<32x32xf32>, vector<8x32xf32> -> vector<8x32xf32>
    %c0_37 = arith.constant 0 : index
    %c0_38 = arith.constant 0 : index
    %c0_39 = arith.constant 0 : index
    %c0_40 = arith.constant 0 : index
    %61 = vector.load %arg6[%c0_37, %c0_38, %c0_39, %c0_40] : memref<2x3x1x32xf32, #tpu.memory_space<vmem>>, vector<1x1x1x32xf32>
    %62 = vector.shape_cast %61 : vector<1x1x1x32xf32> to vector<1x32xf32>
    %63 = vector.broadcast %62 : vector<1x32xf32> to vector<8x32xf32>
    %64 = arith.addf %60, %63 : vector<8x32xf32>
    %c0_41 = arith.constant 0 : index
    %c1_42 = arith.constant 1 : index
    %c0_43 = arith.constant 0 : index
    %c0_44 = arith.constant 0 : index
    %65 = vector.load %arg5[%c0_41, %c1_42, %c0_43, %c0_44] : memref<2x3x32x32xf32, #tpu.memory_space<vmem>>, vector<1x1x32x32xf32>
    %66 = vector.shape_cast %65 : vector<1x1x32x32xf32> to vector<32x32xf32>
    %cst_45 = arith.constant dense<0.000000e+00> : vector<8x32xf32>
    %67 = tpu.matmul %57, %66, %cst_45 {dimension_numbers = #tpu.dot_dimension_numbers<[1], [0], [0], [1], [0, 0, 1, 1], [], []>} : vector<8x32xf32>, vector<32x32xf32>, vector<8x32xf32> -> vector<8x32xf32>
    %c0_46 = arith.constant 0 : index
    %c1_47 = arith.constant 1 : index
    %c0_48 = arith.constant 0 : index
    %c0_49 = arith.constant 0 : index
    %68 = vector.load %arg6[%c0_46, %c1_47, %c0_48, %c0_49] : memref<2x3x1x32xf32, #tpu.memory_space<vmem>>, vector<1x1x1x32xf32>
    %69 = vector.shape_cast %68 : vector<1x1x1x32xf32> to vector<1x32xf32>
    %70 = vector.broadcast %69 : vector<1x32xf32> to vector<8x32xf32>
    %71 = arith.addf %67, %70 : vector<8x32xf32>
    %c0_50 = arith.constant 0 : index
    %c2_51 = arith.constant 2 : index
    %c0_52 = arith.constant 0 : index
    %c0_53 = arith.constant 0 : index
    %72 = vector.load %arg5[%c0_50, %c2_51, %c0_52, %c0_53] : memref<2x3x32x32xf32, #tpu.memory_space<vmem>>, vector<1x1x32x32xf32>
    %73 = vector.shape_cast %72 : vector<1x1x32x32xf32> to vector<32x32xf32>
    %cst_54 = arith.constant dense<0.000000e+00> : vector<8x32xf32>
    %74 = tpu.matmul %57, %73, %cst_54 {dimension_numbers = #tpu.dot_dimension_numbers<[1], [0], [0], [1], [0, 0, 1, 1], [], []>} : vector<8x32xf32>, vector<32x32xf32>, vector<8x32xf32> -> vector<8x32xf32>
    %c0_55 = arith.constant 0 : index
    %c2_56 = arith.constant 2 : index
    %c0_57 = arith.constant 0 : index
    %c0_58 = arith.constant 0 : index
    %75 = vector.load %arg6[%c0_55, %c2_56, %c0_57, %c0_58] : memref<2x3x1x32xf32, #tpu.memory_space<vmem>>, vector<1x1x1x32xf32>
    %76 = vector.shape_cast %75 : vector<1x1x1x32xf32> to vector<1x32xf32>
    %77 = vector.broadcast %76 : vector<1x32xf32> to vector<8x32xf32>
    %78 = arith.addf %74, %77 : vector<8x32xf32>
    %cst_59 = arith.constant 0.000000e+00 : f32
    %79 = vector.broadcast %cst_59 : f32 to vector<8x32xf32>
    %80 = vector.extract_strided_slice %64 {offsets = [0, 0], sizes = [8, 8], strides = [1, 1]} : vector<8x32xf32> to vector<8x8xf32>
    %81 = vector.extract_strided_slice %71 {offsets = [0, 0], sizes = [8, 8], strides = [1, 1]} : vector<8x32xf32> to vector<8x8xf32>
    %82 = vector.extract_strided_slice %78 {offsets = [0, 0], sizes = [8, 8], strides = [1, 1]} : vector<8x32xf32> to vector<8x8xf32>
    %cst_60 = arith.constant dense<0.000000e+00> : vector<8x8xf32>
    %83 = tpu.matmul %80, %81, %cst_60 {dimension_numbers = #tpu.dot_dimension_numbers<[1], [1], [0], [0], [0, 0, 1, 0], [], []>} : vector<8x8xf32>, vector<8x8xf32>, vector<8x8xf32> -> vector<8x8xf32>
    %84 = arith.addf %83, %5 : vector<8x8xf32>
    %cst_61 = arith.constant dense<0xFF800000> : vector<8xf32>
    %85 = vector.multi_reduction <maximumf>, %84, %cst_61 [1] : vector<8x8xf32> to vector<8xf32>
    %86 = vector.shape_cast %85 : vector<8xf32> to vector<8x1xf32>
    %87 = vector.broadcast %86 : vector<8x1xf32> to vector<8x8xf32>
    %88 = arith.subf %84, %87 : vector<8x8xf32>
    %89 = math.exp %88 : vector<8x8xf32>
    %cst_62 = arith.constant dense<0.000000e+00> : vector<8xf32>
    %90 = vector.multi_reduction <add>, %89, %cst_62 [1] : vector<8x8xf32> to vector<8xf32>
    %91 = vector.shape_cast %90 : vector<8xf32> to vector<8x1xf32>
    %92 = tpu.reciprocal %91 {approx = true} : vector<8x1xf32> -> vector<8x1xf32>
    %93 = vector.broadcast %92 : vector<8x1xf32> to vector<8x8xf32>
    %94 = arith.mulf %89, %93 : vector<8x8xf32>
    %cst_63 = arith.constant dense<0.000000e+00> : vector<8x8xf32>
    %95 = tpu.matmul %94, %82, %cst_63 {dimension_numbers = #tpu.dot_dimension_numbers<[1], [0], [0], [1], [0, 0, 1, 1], [], []>} : vector<8x8xf32>, vector<8x8xf32>, vector<8x8xf32> -> vector<8x8xf32>
    %c0_64 = arith.constant 0 : index
    %c0_65 = arith.constant 0 : index
    %c0_66 = arith.constant 0 : index
    %c0_67 = arith.constant 0 : index
    %96 = vector.load %arg7[%c0_64, %c0_65, %c0_66, %c0_67] : memref<2x4x8x32xf32, #tpu.memory_space<vmem>>, vector<1x1x8x32xf32>
    %97 = vector.shape_cast %96 : vector<1x1x8x32xf32> to vector<8x32xf32>
    %cst_68 = arith.constant dense<0.000000e+00> : vector<8x32xf32>
    %98 = tpu.matmul %95, %97, %cst_68 {dimension_numbers = #tpu.dot_dimension_numbers<[1], [0], [0], [1], [0, 0, 1, 1], [], []>} : vector<8x8xf32>, vector<8x32xf32>, vector<8x32xf32> -> vector<8x32xf32>
    %99 = arith.addf %79, %98 : vector<8x32xf32>
    %100 = vector.extract_strided_slice %64 {offsets = [0, 8], sizes = [8, 8], strides = [1, 1]} : vector<8x32xf32> to vector<8x8xf32>
    %101 = vector.extract_strided_slice %71 {offsets = [0, 8], sizes = [8, 8], strides = [1, 1]} : vector<8x32xf32> to vector<8x8xf32>
    %102 = vector.extract_strided_slice %78 {offsets = [0, 8], sizes = [8, 8], strides = [1, 1]} : vector<8x32xf32> to vector<8x8xf32>
    %cst_69 = arith.constant dense<0.000000e+00> : vector<8x8xf32>
    %103 = tpu.matmul %100, %101, %cst_69 {dimension_numbers = #tpu.dot_dimension_numbers<[1], [1], [0], [0], [0, 0, 1, 0], [], []>} : vector<8x8xf32>, vector<8x8xf32>, vector<8x8xf32> -> vector<8x8xf32>
    %104 = arith.addf %103, %5 : vector<8x8xf32>
    %cst_70 = arith.constant dense<0xFF800000> : vector<8xf32>
    %105 = vector.multi_reduction <maximumf>, %104, %cst_70 [1] : vector<8x8xf32> to vector<8xf32>
    %106 = vector.shape_cast %105 : vector<8xf32> to vector<8x1xf32>
    %107 = vector.broadcast %106 : vector<8x1xf32> to vector<8x8xf32>
    %108 = arith.subf %104, %107 : vector<8x8xf32>
    %109 = math.exp %108 : vector<8x8xf32>
    %cst_71 = arith.constant dense<0.000000e+00> : vector<8xf32>
    %110 = vector.multi_reduction <add>, %109, %cst_71 [1] : vector<8x8xf32> to vector<8xf32>
    %111 = vector.shape_cast %110 : vector<8xf32> to vector<8x1xf32>
    %112 = tpu.reciprocal %111 {approx = true} : vector<8x1xf32> -> vector<8x1xf32>
    %113 = vector.broadcast %112 : vector<8x1xf32> to vector<8x8xf32>
    %114 = arith.mulf %109, %113 : vector<8x8xf32>
    %cst_72 = arith.constant dense<0.000000e+00> : vector<8x8xf32>
    %115 = tpu.matmul %114, %102, %cst_72 {dimension_numbers = #tpu.dot_dimension_numbers<[1], [0], [0], [1], [0, 0, 1, 1], [], []>} : vector<8x8xf32>, vector<8x8xf32>, vector<8x8xf32> -> vector<8x8xf32>
    %c0_73 = arith.constant 0 : index
    %c1_74 = arith.constant 1 : index
    %c0_75 = arith.constant 0 : index
    %c0_76 = arith.constant 0 : index
    %116 = vector.load %arg7[%c0_73, %c1_74, %c0_75, %c0_76] : memref<2x4x8x32xf32, #tpu.memory_space<vmem>>, vector<1x1x8x32xf32>
    %117 = vector.shape_cast %116 : vector<1x1x8x32xf32> to vector<8x32xf32>
    %cst_77 = arith.constant dense<0.000000e+00> : vector<8x32xf32>
    %118 = tpu.matmul %115, %117, %cst_77 {dimension_numbers = #tpu.dot_dimension_numbers<[1], [0], [0], [1], [0, 0, 1, 1], [], []>} : vector<8x8xf32>, vector<8x32xf32>, vector<8x32xf32> -> vector<8x32xf32>
    %119 = arith.addf %99, %118 : vector<8x32xf32>
    %120 = vector.extract_strided_slice %64 {offsets = [0, 16], sizes = [8, 8], strides = [1, 1]} : vector<8x32xf32> to vector<8x8xf32>
    %121 = vector.extract_strided_slice %71 {offsets = [0, 16], sizes = [8, 8], strides = [1, 1]} : vector<8x32xf32> to vector<8x8xf32>
    %122 = vector.extract_strided_slice %78 {offsets = [0, 16], sizes = [8, 8], strides = [1, 1]} : vector<8x32xf32> to vector<8x8xf32>
    %cst_78 = arith.constant dense<0.000000e+00> : vector<8x8xf32>
    %123 = tpu.matmul %120, %121, %cst_78 {dimension_numbers = #tpu.dot_dimension_numbers<[1], [1], [0], [0], [0, 0, 1, 0], [], []>} : vector<8x8xf32>, vector<8x8xf32>, vector<8x8xf32> -> vector<8x8xf32>
    %124 = arith.addf %123, %5 : vector<8x8xf32>
    %cst_79 = arith.constant dense<0xFF800000> : vector<8xf32>
    %125 = vector.multi_reduction <maximumf>, %124, %cst_79 [1] : vector<8x8xf32> to vector<8xf32>
    %126 = vector.shape_cast %125 : vector<8xf32> to vector<8x1xf32>
    %127 = vector.broadcast %126 : vector<8x1xf32> to vector<8x8xf32>
    %128 = arith.subf %124, %127 : vector<8x8xf32>
    %129 = math.exp %128 : vector<8x8xf32>
    %cst_80 = arith.constant dense<0.000000e+00> : vector<8xf32>
    %130 = vector.multi_reduction <add>, %129, %cst_80 [1] : vector<8x8xf32> to vector<8xf32>
    %131 = vector.shape_cast %130 : vector<8xf32> to vector<8x1xf32>
    %132 = tpu.reciprocal %131 {approx = true} : vector<8x1xf32> -> vector<8x1xf32>
    %133 = vector.broadcast %132 : vector<8x1xf32> to vector<8x8xf32>
    %134 = arith.mulf %129, %133 : vector<8x8xf32>
    %cst_81 = arith.constant dense<0.000000e+00> : vector<8x8xf32>
    %135 = tpu.matmul %134, %122, %cst_81 {dimension_numbers = #tpu.dot_dimension_numbers<[1], [0], [0], [1], [0, 0, 1, 1], [], []>} : vector<8x8xf32>, vector<8x8xf32>, vector<8x8xf32> -> vector<8x8xf32>
    %c0_82 = arith.constant 0 : index
    %c2_83 = arith.constant 2 : index
    %c0_84 = arith.constant 0 : index
    %c0_85 = arith.constant 0 : index
    %136 = vector.load %arg7[%c0_82, %c2_83, %c0_84, %c0_85] : memref<2x4x8x32xf32, #tpu.memory_space<vmem>>, vector<1x1x8x32xf32>
    %137 = vector.shape_cast %136 : vector<1x1x8x32xf32> to vector<8x32xf32>
    %cst_86 = arith.constant dense<0.000000e+00> : vector<8x32xf32>
    %138 = tpu.matmul %135, %137, %cst_86 {dimension_numbers = #tpu.dot_dimension_numbers<[1], [0], [0], [1], [0, 0, 1, 1], [], []>} : vector<8x8xf32>, vector<8x32xf32>, vector<8x32xf32> -> vector<8x32xf32>
    %139 = arith.addf %119, %138 : vector<8x32xf32>
    %140 = vector.extract_strided_slice %64 {offsets = [0, 24], sizes = [8, 8], strides = [1, 1]} : vector<8x32xf32> to vector<8x8xf32>
    %141 = vector.extract_strided_slice %71 {offsets = [0, 24], sizes = [8, 8], strides = [1, 1]} : vector<8x32xf32> to vector<8x8xf32>
    %142 = vector.extract_strided_slice %78 {offsets = [0, 24], sizes = [8, 8], strides = [1, 1]} : vector<8x32xf32> to vector<8x8xf32>
    %cst_87 = arith.constant dense<0.000000e+00> : vector<8x8xf32>
    %143 = tpu.matmul %140, %141, %cst_87 {dimension_numbers = #tpu.dot_dimension_numbers<[1], [1], [0], [0], [0, 0, 1, 0], [], []>} : vector<8x8xf32>, vector<8x8xf32>, vector<8x8xf32> -> vector<8x8xf32>
    %144 = arith.addf %143, %5 : vector<8x8xf32>
    %cst_88 = arith.constant dense<0xFF800000> : vector<8xf32>
    %145 = vector.multi_reduction <maximumf>, %144, %cst_88 [1] : vector<8x8xf32> to vector<8xf32>
    %146 = vector.shape_cast %145 : vector<8xf32> to vector<8x1xf32>
    %147 = vector.broadcast %146 : vector<8x1xf32> to vector<8x8xf32>
    %148 = arith.subf %144, %147 : vector<8x8xf32>
    %149 = math.exp %148 : vector<8x8xf32>
    %cst_89 = arith.constant dense<0.000000e+00> : vector<8xf32>
    %150 = vector.multi_reduction <add>, %149, %cst_89 [1] : vector<8x8xf32> to vector<8xf32>
    %151 = vector.shape_cast %150 : vector<8xf32> to vector<8x1xf32>
    %152 = tpu.reciprocal %151 {approx = true} : vector<8x1xf32> -> vector<8x1xf32>
    %153 = vector.broadcast %152 : vector<8x1xf32> to vector<8x8xf32>
    %154 = arith.mulf %149, %153 : vector<8x8xf32>
    %cst_90 = arith.constant dense<0.000000e+00> : vector<8x8xf32>
    %155 = tpu.matmul %154, %142, %cst_90 {dimension_numbers = #tpu.dot_dimension_numbers<[1], [0], [0], [1], [0, 0, 1, 1], [], []>} : vector<8x8xf32>, vector<8x8xf32>, vector<8x8xf32> -> vector<8x8xf32>
    %c0_91 = arith.constant 0 : index
    %c3_92 = arith.constant 3 : index
    %c0_93 = arith.constant 0 : index
    %c0_94 = arith.constant 0 : index
    %156 = vector.load %arg7[%c0_91, %c3_92, %c0_93, %c0_94] : memref<2x4x8x32xf32, #tpu.memory_space<vmem>>, vector<1x1x8x32xf32>
    %157 = vector.shape_cast %156 : vector<1x1x8x32xf32> to vector<8x32xf32>
    %cst_95 = arith.constant dense<0.000000e+00> : vector<8x32xf32>
    %158 = tpu.matmul %155, %157, %cst_95 {dimension_numbers = #tpu.dot_dimension_numbers<[1], [0], [0], [1], [0, 0, 1, 1], [], []>} : vector<8x8xf32>, vector<8x32xf32>, vector<8x32xf32> -> vector<8x32xf32>
    %159 = arith.addf %139, %158 : vector<8x32xf32>
    %160 = arith.addf %1, %159 : vector<8x32xf32>
    %c0_96 = arith.constant 0 : index
    %c0_97 = arith.constant 0 : index
    %c0_98 = arith.constant 0 : index
    %161 = vector.load %arg8[%c0_96, %c0_97, %c0_98] : memref<2x1x32xf32, #tpu.memory_space<vmem>>, vector<1x1x32xf32>
    %162 = vector.shape_cast %161 : vector<1x1x32xf32> to vector<1x32xf32>
    %163 = vector.broadcast %162 : vector<1x32xf32> to vector<8x32xf32>
    %164 = arith.addf %160, %163 : vector<8x32xf32>
    %c0_99 = arith.constant 0 : index
    %c4 = arith.constant 4 : index
    %c0_100 = arith.constant 0 : index
    %c0_101 = arith.constant 0 : index
    %165 = vector.load %arg4[%c0_99, %c4, %c0_100, %c0_101] : memref<2x6x1x32xf32, #tpu.memory_space<vmem>>, vector<1x1x1x32xf32>
    %166 = vector.shape_cast %165 : vector<1x1x1x32xf32> to vector<1x32xf32>
    %c0_102 = arith.constant 0 : index
    %c5 = arith.constant 5 : index
    %c0_103 = arith.constant 0 : index
    %c0_104 = arith.constant 0 : index
    %167 = vector.load %arg4[%c0_102, %c5, %c0_103, %c0_104] : memref<2x6x1x32xf32, #tpu.memory_space<vmem>>, vector<1x1x1x32xf32>
    %168 = vector.shape_cast %167 : vector<1x1x1x32xf32> to vector<1x32xf32>
    %cst_105 = arith.constant dense<0.000000e+00> : vector<8xf32>
    %169 = vector.multi_reduction <add>, %164, %cst_105 [1] : vector<8x32xf32> to vector<8xf32>
    %170 = vector.shape_cast %169 : vector<8xf32> to vector<8x1xf32>
    %cst_106 = arith.constant 3.200000e+01 : f32
    %171 = vector.broadcast %cst_106 : f32 to vector<8x1xf32>
    %172 = arith.divf %170, %171 : vector<8x1xf32>
    %173 = vector.broadcast %172 : vector<8x1xf32> to vector<8x32xf32>
    %174 = arith.subf %164, %173 : vector<8x32xf32>
    %175 = arith.mulf %174, %174 : vector<8x32xf32>
    %cst_107 = arith.constant dense<0.000000e+00> : vector<8xf32>
    %176 = vector.multi_reduction <add>, %175, %cst_107 [1] : vector<8x32xf32> to vector<8xf32>
    %177 = vector.shape_cast %176 : vector<8xf32> to vector<8x1xf32>
    %cst_108 = arith.constant 0.0322580636 : f32
    %178 = vector.broadcast %cst_108 : f32 to vector<8x1xf32>
    %179 = arith.mulf %177, %178 : vector<8x1xf32>
    %180 = math.sqrt %179 : vector<8x1xf32>
    %cst_109 = arith.constant 9.99999997E-7 : f32
    %181 = vector.broadcast %cst_109 : f32 to vector<8x1xf32>
    %182 = arith.addf %180, %181 : vector<8x1xf32>
    %cst_110 = arith.constant 1.000000e+00 : f32
    %183 = vector.broadcast %cst_110 : f32 to vector<8x1xf32>
    %184 = arith.divf %183, %182 : vector<8x1xf32>
    %185 = vector.broadcast %184 : vector<8x1xf32> to vector<8x32xf32>
    %186 = arith.mulf %174, %185 : vector<8x32xf32>
    %187 = vector.broadcast %166 : vector<1x32xf32> to vector<8x32xf32>
    %188 = arith.mulf %187, %186 : vector<8x32xf32>
    %189 = vector.broadcast %168 : vector<1x32xf32> to vector<8x32xf32>
    %190 = arith.addf %188, %189 : vector<8x32xf32>
    %c0_111 = arith.constant 0 : index
    %c0_112 = arith.constant 0 : index
    %c0_113 = arith.constant 0 : index
    %191 = vector.load %arg9[%c0_111, %c0_112, %c0_113] : memref<2x32x64xf32, #tpu.memory_space<vmem>>, vector<1x32x64xf32>
    %192 = vector.shape_cast %191 : vector<1x32x64xf32> to vector<32x64xf32>
    %cst_114 = arith.constant dense<0.000000e+00> : vector<8x64xf32>
    %193 = tpu.matmul %190, %192, %cst_114 {dimension_numbers = #tpu.dot_dimension_numbers<[1], [0], [0], [1], [0, 0, 1, 1], [], []>} : vector<8x32xf32>, vector<32x64xf32>, vector<8x64xf32> -> vector<8x64xf32>
    %c0_115 = arith.constant 0 : index
    %c0_116 = arith.constant 0 : index
    %c0_117 = arith.constant 0 : index
    %194 = vector.load %arg10[%c0_115, %c0_116, %c0_117] : memref<2x1x64xf32, #tpu.memory_space<vmem>>, vector<1x1x64xf32>
    %195 = vector.shape_cast %194 : vector<1x1x64xf32> to vector<1x64xf32>
    %196 = vector.broadcast %195 : vector<1x64xf32> to vector<8x64xf32>
    %197 = arith.addf %193, %196 : vector<8x64xf32>
    %cst_118 = arith.constant 0.000000e+00 : f32
    %198 = vector.broadcast %cst_118 : f32 to vector<8x64xf32>
    %199 = arith.maximumf %197, %198 : vector<8x64xf32>
    %c0_119 = arith.constant 0 : index
    %c0_120 = arith.constant 0 : index
    %c0_121 = arith.constant 0 : index
    %200 = vector.load %arg11[%c0_119, %c0_120, %c0_121] : memref<2x64x32xf32, #tpu.memory_space<vmem>>, vector<1x64x32xf32>
    %201 = vector.shape_cast %200 : vector<1x64x32xf32> to vector<64x32xf32>
    %cst_122 = arith.constant dense<0.000000e+00> : vector<8x32xf32>
    %202 = tpu.matmul %199, %201, %cst_122 {dimension_numbers = #tpu.dot_dimension_numbers<[1], [0], [0], [1], [0, 0, 1, 1], [], []>} : vector<8x64xf32>, vector<64x32xf32>, vector<8x32xf32> -> vector<8x32xf32>
    %203 = arith.addf %164, %202 : vector<8x32xf32>
    %c0_123 = arith.constant 0 : index
    %c0_124 = arith.constant 0 : index
    %c0_125 = arith.constant 0 : index
    %204 = vector.load %arg12[%c0_123, %c0_124, %c0_125] : memref<2x1x32xf32, #tpu.memory_space<vmem>>, vector<1x1x32xf32>
    %205 = vector.shape_cast %204 : vector<1x1x32xf32> to vector<1x32xf32>
    %206 = vector.broadcast %205 : vector<1x32xf32> to vector<8x32xf32>
    %207 = arith.addf %203, %206 : vector<8x32xf32>
    %c1_126 = arith.constant 1 : index
    %c0_127 = arith.constant 0 : index
    %c0_128 = arith.constant 0 : index
    %c0_129 = arith.constant 0 : index
    %208 = vector.load %arg4[%c1_126, %c0_127, %c0_128, %c0_129] : memref<2x6x1x32xf32, #tpu.memory_space<vmem>>, vector<1x1x1x32xf32>
    %209 = vector.shape_cast %208 : vector<1x1x1x32xf32> to vector<1x32xf32>
    %c1_130 = arith.constant 1 : index
    %c1_131 = arith.constant 1 : index
    %c0_132 = arith.constant 0 : index
    %c0_133 = arith.constant 0 : index
    %210 = vector.load %arg4[%c1_130, %c1_131, %c0_132, %c0_133] : memref<2x6x1x32xf32, #tpu.memory_space<vmem>>, vector<1x1x1x32xf32>
    %211 = vector.shape_cast %210 : vector<1x1x1x32xf32> to vector<1x32xf32>
    %cst_134 = arith.constant dense<0.000000e+00> : vector<8xf32>
    %212 = vector.multi_reduction <add>, %207, %cst_134 [1] : vector<8x32xf32> to vector<8xf32>
    %213 = vector.shape_cast %212 : vector<8xf32> to vector<8x1xf32>
    %cst_135 = arith.constant 3.200000e+01 : f32
    %214 = vector.broadcast %cst_135 : f32 to vector<8x1xf32>
    %215 = arith.divf %213, %214 : vector<8x1xf32>
    %216 = vector.broadcast %215 : vector<8x1xf32> to vector<8x32xf32>
    %217 = arith.subf %207, %216 : vector<8x32xf32>
    %218 = arith.mulf %217, %217 : vector<8x32xf32>
    %cst_136 = arith.constant dense<0.000000e+00> : vector<8xf32>
    %219 = vector.multi_reduction <add>, %218, %cst_136 [1] : vector<8x32xf32> to vector<8xf32>
    %220 = vector.shape_cast %219 : vector<8xf32> to vector<8x1xf32>
    %cst_137 = arith.constant 0.0322580636 : f32
    %221 = vector.broadcast %cst_137 : f32 to vector<8x1xf32>
    %222 = arith.mulf %220, %221 : vector<8x1xf32>
    %223 = math.sqrt %222 : vector<8x1xf32>
    %cst_138 = arith.constant 9.99999997E-7 : f32
    %224 = vector.broadcast %cst_138 : f32 to vector<8x1xf32>
    %225 = arith.addf %223, %224 : vector<8x1xf32>
    %cst_139 = arith.constant 1.000000e+00 : f32
    %226 = vector.broadcast %cst_139 : f32 to vector<8x1xf32>
    %227 = arith.divf %226, %225 : vector<8x1xf32>
    %228 = vector.broadcast %227 : vector<8x1xf32> to vector<8x32xf32>
    %229 = arith.mulf %217, %228 : vector<8x32xf32>
    %230 = vector.broadcast %209 : vector<1x32xf32> to vector<8x32xf32>
    %231 = arith.mulf %230, %229 : vector<8x32xf32>
    %232 = vector.broadcast %211 : vector<1x32xf32> to vector<8x32xf32>
    %233 = arith.addf %231, %232 : vector<8x32xf32>
    %c1_140 = arith.constant 1 : index
    %c2_141 = arith.constant 2 : index
    %c0_142 = arith.constant 0 : index
    %c0_143 = arith.constant 0 : index
    %234 = vector.load %arg4[%c1_140, %c2_141, %c0_142, %c0_143] : memref<2x6x1x32xf32, #tpu.memory_space<vmem>>, vector<1x1x1x32xf32>
    %235 = vector.shape_cast %234 : vector<1x1x1x32xf32> to vector<1x32xf32>
    %236 = vector.broadcast %235 : vector<1x32xf32> to vector<8x32xf32>
    %237 = arith.mulf %236, %23 : vector<8x32xf32>
    %c1_144 = arith.constant 1 : index
    %c3_145 = arith.constant 3 : index
    %c0_146 = arith.constant 0 : index
    %c0_147 = arith.constant 0 : index
    %238 = vector.load %arg4[%c1_144, %c3_145, %c0_146, %c0_147] : memref<2x6x1x32xf32, #tpu.memory_space<vmem>>, vector<1x1x1x32xf32>
    %239 = vector.shape_cast %238 : vector<1x1x1x32xf32> to vector<1x32xf32>
    %240 = vector.broadcast %239 : vector<1x32xf32> to vector<8x32xf32>
    %241 = arith.addf %237, %240 : vector<8x32xf32>
    %c1_148 = arith.constant 1 : index
    %c0_149 = arith.constant 0 : index
    %c0_150 = arith.constant 0 : index
    %c0_151 = arith.constant 0 : index
    %242 = vector.load %arg5[%c1_148, %c0_149, %c0_150, %c0_151] : memref<2x3x32x32xf32, #tpu.memory_space<vmem>>, vector<1x1x32x32xf32>
    %243 = vector.shape_cast %242 : vector<1x1x32x32xf32> to vector<32x32xf32>
    %cst_152 = arith.constant dense<0.000000e+00> : vector<8x32xf32>
    %244 = tpu.matmul %233, %243, %cst_152 {dimension_numbers = #tpu.dot_dimension_numbers<[1], [0], [0], [1], [0, 0, 1, 1], [], []>} : vector<8x32xf32>, vector<32x32xf32>, vector<8x32xf32> -> vector<8x32xf32>
    %c1_153 = arith.constant 1 : index
    %c0_154 = arith.constant 0 : index
    %c0_155 = arith.constant 0 : index
    %c0_156 = arith.constant 0 : index
    %245 = vector.load %arg6[%c1_153, %c0_154, %c0_155, %c0_156] : memref<2x3x1x32xf32, #tpu.memory_space<vmem>>, vector<1x1x1x32xf32>
    %246 = vector.shape_cast %245 : vector<1x1x1x32xf32> to vector<1x32xf32>
    %247 = vector.broadcast %246 : vector<1x32xf32> to vector<8x32xf32>
    %248 = arith.addf %244, %247 : vector<8x32xf32>
    %c1_157 = arith.constant 1 : index
    %c1_158 = arith.constant 1 : index
    %c0_159 = arith.constant 0 : index
    %c0_160 = arith.constant 0 : index
    %249 = vector.load %arg5[%c1_157, %c1_158, %c0_159, %c0_160] : memref<2x3x32x32xf32, #tpu.memory_space<vmem>>, vector<1x1x32x32xf32>
    %250 = vector.shape_cast %249 : vector<1x1x32x32xf32> to vector<32x32xf32>
    %cst_161 = arith.constant dense<0.000000e+00> : vector<8x32xf32>
    %251 = tpu.matmul %241, %250, %cst_161 {dimension_numbers = #tpu.dot_dimension_numbers<[1], [0], [0], [1], [0, 0, 1, 1], [], []>} : vector<8x32xf32>, vector<32x32xf32>, vector<8x32xf32> -> vector<8x32xf32>
    %c1_162 = arith.constant 1 : index
    %c1_163 = arith.constant 1 : index
    %c0_164 = arith.constant 0 : index
    %c0_165 = arith.constant 0 : index
    %252 = vector.load %arg6[%c1_162, %c1_163, %c0_164, %c0_165] : memref<2x3x1x32xf32, #tpu.memory_space<vmem>>, vector<1x1x1x32xf32>
    %253 = vector.shape_cast %252 : vector<1x1x1x32xf32> to vector<1x32xf32>
    %254 = vector.broadcast %253 : vector<1x32xf32> to vector<8x32xf32>
    %255 = arith.addf %251, %254 : vector<8x32xf32>
    %c1_166 = arith.constant 1 : index
    %c2_167 = arith.constant 2 : index
    %c0_168 = arith.constant 0 : index
    %c0_169 = arith.constant 0 : index
    %256 = vector.load %arg5[%c1_166, %c2_167, %c0_168, %c0_169] : memref<2x3x32x32xf32, #tpu.memory_space<vmem>>, vector<1x1x32x32xf32>
    %257 = vector.shape_cast %256 : vector<1x1x32x32xf32> to vector<32x32xf32>
    %cst_170 = arith.constant dense<0.000000e+00> : vector<8x32xf32>
    %258 = tpu.matmul %241, %257, %cst_170 {dimension_numbers = #tpu.dot_dimension_numbers<[1], [0], [0], [1], [0, 0, 1, 1], [], []>} : vector<8x32xf32>, vector<32x32xf32>, vector<8x32xf32> -> vector<8x32xf32>
    %c1_171 = arith.constant 1 : index
    %c2_172 = arith.constant 2 : index
    %c0_173 = arith.constant 0 : index
    %c0_174 = arith.constant 0 : index
    %259 = vector.load %arg6[%c1_171, %c2_172, %c0_173, %c0_174] : memref<2x3x1x32xf32, #tpu.memory_space<vmem>>, vector<1x1x1x32xf32>
    %260 = vector.shape_cast %259 : vector<1x1x1x32xf32> to vector<1x32xf32>
    %261 = vector.broadcast %260 : vector<1x32xf32> to vector<8x32xf32>
    %262 = arith.addf %258, %261 : vector<8x32xf32>
    %cst_175 = arith.constant 0.000000e+00 : f32
    %263 = vector.broadcast %cst_175 : f32 to vector<8x32xf32>
    %264 = vector.extract_strided_slice %248 {offsets = [0, 0], sizes = [8, 8], strides = [1, 1]} : vector<8x32xf32> to vector<8x8xf32>
    %265 = vector.extract_strided_slice %255 {offsets = [0, 0], sizes = [8, 8], strides = [1, 1]} : vector<8x32xf32> to vector<8x8xf32>
    %266 = vector.extract_strided_slice %262 {offsets = [0, 0], sizes = [8, 8], strides = [1, 1]} : vector<8x32xf32> to vector<8x8xf32>
    %cst_176 = arith.constant dense<0.000000e+00> : vector<8x8xf32>
    %267 = tpu.matmul %264, %265, %cst_176 {dimension_numbers = #tpu.dot_dimension_numbers<[1], [1], [0], [0], [0, 0, 1, 0], [], []>} : vector<8x8xf32>, vector<8x8xf32>, vector<8x8xf32> -> vector<8x8xf32>
    %268 = arith.addf %267, %5 : vector<8x8xf32>
    %cst_177 = arith.constant dense<0xFF800000> : vector<8xf32>
    %269 = vector.multi_reduction <maximumf>, %268, %cst_177 [1] : vector<8x8xf32> to vector<8xf32>
    %270 = vector.shape_cast %269 : vector<8xf32> to vector<8x1xf32>
    %271 = vector.broadcast %270 : vector<8x1xf32> to vector<8x8xf32>
    %272 = arith.subf %268, %271 : vector<8x8xf32>
    %273 = math.exp %272 : vector<8x8xf32>
    %cst_178 = arith.constant dense<0.000000e+00> : vector<8xf32>
    %274 = vector.multi_reduction <add>, %273, %cst_178 [1] : vector<8x8xf32> to vector<8xf32>
    %275 = vector.shape_cast %274 : vector<8xf32> to vector<8x1xf32>
    %276 = tpu.reciprocal %275 {approx = true} : vector<8x1xf32> -> vector<8x1xf32>
    %277 = vector.broadcast %276 : vector<8x1xf32> to vector<8x8xf32>
    %278 = arith.mulf %273, %277 : vector<8x8xf32>
    %cst_179 = arith.constant dense<0.000000e+00> : vector<8x8xf32>
    %279 = tpu.matmul %278, %266, %cst_179 {dimension_numbers = #tpu.dot_dimension_numbers<[1], [0], [0], [1], [0, 0, 1, 1], [], []>} : vector<8x8xf32>, vector<8x8xf32>, vector<8x8xf32> -> vector<8x8xf32>
    %c1_180 = arith.constant 1 : index
    %c0_181 = arith.constant 0 : index
    %c0_182 = arith.constant 0 : index
    %c0_183 = arith.constant 0 : index
    %280 = vector.load %arg7[%c1_180, %c0_181, %c0_182, %c0_183] : memref<2x4x8x32xf32, #tpu.memory_space<vmem>>, vector<1x1x8x32xf32>
    %281 = vector.shape_cast %280 : vector<1x1x8x32xf32> to vector<8x32xf32>
    %cst_184 = arith.constant dense<0.000000e+00> : vector<8x32xf32>
    %282 = tpu.matmul %279, %281, %cst_184 {dimension_numbers = #tpu.dot_dimension_numbers<[1], [0], [0], [1], [0, 0, 1, 1], [], []>} : vector<8x8xf32>, vector<8x32xf32>, vector<8x32xf32> -> vector<8x32xf32>
    %283 = arith.addf %263, %282 : vector<8x32xf32>
    %284 = vector.extract_strided_slice %248 {offsets = [0, 8], sizes = [8, 8], strides = [1, 1]} : vector<8x32xf32> to vector<8x8xf32>
    %285 = vector.extract_strided_slice %255 {offsets = [0, 8], sizes = [8, 8], strides = [1, 1]} : vector<8x32xf32> to vector<8x8xf32>
    %286 = vector.extract_strided_slice %262 {offsets = [0, 8], sizes = [8, 8], strides = [1, 1]} : vector<8x32xf32> to vector<8x8xf32>
    %cst_185 = arith.constant dense<0.000000e+00> : vector<8x8xf32>
    %287 = tpu.matmul %284, %285, %cst_185 {dimension_numbers = #tpu.dot_dimension_numbers<[1], [1], [0], [0], [0, 0, 1, 0], [], []>} : vector<8x8xf32>, vector<8x8xf32>, vector<8x8xf32> -> vector<8x8xf32>
    %288 = arith.addf %287, %5 : vector<8x8xf32>
    %cst_186 = arith.constant dense<0xFF800000> : vector<8xf32>
    %289 = vector.multi_reduction <maximumf>, %288, %cst_186 [1] : vector<8x8xf32> to vector<8xf32>
    %290 = vector.shape_cast %289 : vector<8xf32> to vector<8x1xf32>
    %291 = vector.broadcast %290 : vector<8x1xf32> to vector<8x8xf32>
    %292 = arith.subf %288, %291 : vector<8x8xf32>
    %293 = math.exp %292 : vector<8x8xf32>
    %cst_187 = arith.constant dense<0.000000e+00> : vector<8xf32>
    %294 = vector.multi_reduction <add>, %293, %cst_187 [1] : vector<8x8xf32> to vector<8xf32>
    %295 = vector.shape_cast %294 : vector<8xf32> to vector<8x1xf32>
    %296 = tpu.reciprocal %295 {approx = true} : vector<8x1xf32> -> vector<8x1xf32>
    %297 = vector.broadcast %296 : vector<8x1xf32> to vector<8x8xf32>
    %298 = arith.mulf %293, %297 : vector<8x8xf32>
    %cst_188 = arith.constant dense<0.000000e+00> : vector<8x8xf32>
    %299 = tpu.matmul %298, %286, %cst_188 {dimension_numbers = #tpu.dot_dimension_numbers<[1], [0], [0], [1], [0, 0, 1, 1], [], []>} : vector<8x8xf32>, vector<8x8xf32>, vector<8x8xf32> -> vector<8x8xf32>
    %c1_189 = arith.constant 1 : index
    %c1_190 = arith.constant 1 : index
    %c0_191 = arith.constant 0 : index
    %c0_192 = arith.constant 0 : index
    %300 = vector.load %arg7[%c1_189, %c1_190, %c0_191, %c0_192] : memref<2x4x8x32xf32, #tpu.memory_space<vmem>>, vector<1x1x8x32xf32>
    %301 = vector.shape_cast %300 : vector<1x1x8x32xf32> to vector<8x32xf32>
    %cst_193 = arith.constant dense<0.000000e+00> : vector<8x32xf32>
    %302 = tpu.matmul %299, %301, %cst_193 {dimension_numbers = #tpu.dot_dimension_numbers<[1], [0], [0], [1], [0, 0, 1, 1], [], []>} : vector<8x8xf32>, vector<8x32xf32>, vector<8x32xf32> -> vector<8x32xf32>
    %303 = arith.addf %283, %302 : vector<8x32xf32>
    %304 = vector.extract_strided_slice %248 {offsets = [0, 16], sizes = [8, 8], strides = [1, 1]} : vector<8x32xf32> to vector<8x8xf32>
    %305 = vector.extract_strided_slice %255 {offsets = [0, 16], sizes = [8, 8], strides = [1, 1]} : vector<8x32xf32> to vector<8x8xf32>
    %306 = vector.extract_strided_slice %262 {offsets = [0, 16], sizes = [8, 8], strides = [1, 1]} : vector<8x32xf32> to vector<8x8xf32>
    %cst_194 = arith.constant dense<0.000000e+00> : vector<8x8xf32>
    %307 = tpu.matmul %304, %305, %cst_194 {dimension_numbers = #tpu.dot_dimension_numbers<[1], [1], [0], [0], [0, 0, 1, 0], [], []>} : vector<8x8xf32>, vector<8x8xf32>, vector<8x8xf32> -> vector<8x8xf32>
    %308 = arith.addf %307, %5 : vector<8x8xf32>
    %cst_195 = arith.constant dense<0xFF800000> : vector<8xf32>
    %309 = vector.multi_reduction <maximumf>, %308, %cst_195 [1] : vector<8x8xf32> to vector<8xf32>
    %310 = vector.shape_cast %309 : vector<8xf32> to vector<8x1xf32>
    %311 = vector.broadcast %310 : vector<8x1xf32> to vector<8x8xf32>
    %312 = arith.subf %308, %311 : vector<8x8xf32>
    %313 = math.exp %312 : vector<8x8xf32>
    %cst_196 = arith.constant dense<0.000000e+00> : vector<8xf32>
    %314 = vector.multi_reduction <add>, %313, %cst_196 [1] : vector<8x8xf32> to vector<8xf32>
    %315 = vector.shape_cast %314 : vector<8xf32> to vector<8x1xf32>
    %316 = tpu.reciprocal %315 {approx = true} : vector<8x1xf32> -> vector<8x1xf32>
    %317 = vector.broadcast %316 : vector<8x1xf32> to vector<8x8xf32>
    %318 = arith.mulf %313, %317 : vector<8x8xf32>
    %cst_197 = arith.constant dense<0.000000e+00> : vector<8x8xf32>
    %319 = tpu.matmul %318, %306, %cst_197 {dimension_numbers = #tpu.dot_dimension_numbers<[1], [0], [0], [1], [0, 0, 1, 1], [], []>} : vector<8x8xf32>, vector<8x8xf32>, vector<8x8xf32> -> vector<8x8xf32>
    %c1_198 = arith.constant 1 : index
    %c2_199 = arith.constant 2 : index
    %c0_200 = arith.constant 0 : index
    %c0_201 = arith.constant 0 : index
    %320 = vector.load %arg7[%c1_198, %c2_199, %c0_200, %c0_201] : memref<2x4x8x32xf32, #tpu.memory_space<vmem>>, vector<1x1x8x32xf32>
    %321 = vector.shape_cast %320 : vector<1x1x8x32xf32> to vector<8x32xf32>
    %cst_202 = arith.constant dense<0.000000e+00> : vector<8x32xf32>
    %322 = tpu.matmul %319, %321, %cst_202 {dimension_numbers = #tpu.dot_dimension_numbers<[1], [0], [0], [1], [0, 0, 1, 1], [], []>} : vector<8x8xf32>, vector<8x32xf32>, vector<8x32xf32> -> vector<8x32xf32>
    %323 = arith.addf %303, %322 : vector<8x32xf32>
    %324 = vector.extract_strided_slice %248 {offsets = [0, 24], sizes = [8, 8], strides = [1, 1]} : vector<8x32xf32> to vector<8x8xf32>
    %325 = vector.extract_strided_slice %255 {offsets = [0, 24], sizes = [8, 8], strides = [1, 1]} : vector<8x32xf32> to vector<8x8xf32>
    %326 = vector.extract_strided_slice %262 {offsets = [0, 24], sizes = [8, 8], strides = [1, 1]} : vector<8x32xf32> to vector<8x8xf32>
    %cst_203 = arith.constant dense<0.000000e+00> : vector<8x8xf32>
    %327 = tpu.matmul %324, %325, %cst_203 {dimension_numbers = #tpu.dot_dimension_numbers<[1], [1], [0], [0], [0, 0, 1, 0], [], []>} : vector<8x8xf32>, vector<8x8xf32>, vector<8x8xf32> -> vector<8x8xf32>
    %328 = arith.addf %327, %5 : vector<8x8xf32>
    %cst_204 = arith.constant dense<0xFF800000> : vector<8xf32>
    %329 = vector.multi_reduction <maximumf>, %328, %cst_204 [1] : vector<8x8xf32> to vector<8xf32>
    %330 = vector.shape_cast %329 : vector<8xf32> to vector<8x1xf32>
    %331 = vector.broadcast %330 : vector<8x1xf32> to vector<8x8xf32>
    %332 = arith.subf %328, %331 : vector<8x8xf32>
    %333 = math.exp %332 : vector<8x8xf32>
    %cst_205 = arith.constant dense<0.000000e+00> : vector<8xf32>
    %334 = vector.multi_reduction <add>, %333, %cst_205 [1] : vector<8x8xf32> to vector<8xf32>
    %335 = vector.shape_cast %334 : vector<8xf32> to vector<8x1xf32>
    %336 = tpu.reciprocal %335 {approx = true} : vector<8x1xf32> -> vector<8x1xf32>
    %337 = vector.broadcast %336 : vector<8x1xf32> to vector<8x8xf32>
    %338 = arith.mulf %333, %337 : vector<8x8xf32>
    %cst_206 = arith.constant dense<0.000000e+00> : vector<8x8xf32>
    %339 = tpu.matmul %338, %326, %cst_206 {dimension_numbers = #tpu.dot_dimension_numbers<[1], [0], [0], [1], [0, 0, 1, 1], [], []>} : vector<8x8xf32>, vector<8x8xf32>, vector<8x8xf32> -> vector<8x8xf32>
    %c1_207 = arith.constant 1 : index
    %c3_208 = arith.constant 3 : index
    %c0_209 = arith.constant 0 : index
    %c0_210 = arith.constant 0 : index
    %340 = vector.load %arg7[%c1_207, %c3_208, %c0_209, %c0_210] : memref<2x4x8x32xf32, #tpu.memory_space<vmem>>, vector<1x1x8x32xf32>
    %341 = vector.shape_cast %340 : vector<1x1x8x32xf32> to vector<8x32xf32>
    %cst_211 = arith.constant dense<0.000000e+00> : vector<8x32xf32>
    %342 = tpu.matmul %339, %341, %cst_211 {dimension_numbers = #tpu.dot_dimension_numbers<[1], [0], [0], [1], [0, 0, 1, 1], [], []>} : vector<8x8xf32>, vector<8x32xf32>, vector<8x32xf32> -> vector<8x32xf32>
    %343 = arith.addf %323, %342 : vector<8x32xf32>
    %344 = arith.addf %207, %343 : vector<8x32xf32>
    %c1_212 = arith.constant 1 : index
    %c0_213 = arith.constant 0 : index
    %c0_214 = arith.constant 0 : index
    %345 = vector.load %arg8[%c1_212, %c0_213, %c0_214] : memref<2x1x32xf32, #tpu.memory_space<vmem>>, vector<1x1x32xf32>
    %346 = vector.shape_cast %345 : vector<1x1x32xf32> to vector<1x32xf32>
    %347 = vector.broadcast %346 : vector<1x32xf32> to vector<8x32xf32>
    %348 = arith.addf %344, %347 : vector<8x32xf32>
    %c1_215 = arith.constant 1 : index
    %c4_216 = arith.constant 4 : index
    %c0_217 = arith.constant 0 : index
    %c0_218 = arith.constant 0 : index
    %349 = vector.load %arg4[%c1_215, %c4_216, %c0_217, %c0_218] : memref<2x6x1x32xf32, #tpu.memory_space<vmem>>, vector<1x1x1x32xf32>
    %350 = vector.shape_cast %349 : vector<1x1x1x32xf32> to vector<1x32xf32>
    %c1_219 = arith.constant 1 : index
    %c5_220 = arith.constant 5 : index
    %c0_221 = arith.constant 0 : index
    %c0_222 = arith.constant 0 : index
    %351 = vector.load %arg4[%c1_219, %c5_220, %c0_221, %c0_222] : memref<2x6x1x32xf32, #tpu.memory_space<vmem>>, vector<1x1x1x32xf32>
    %352 = vector.shape_cast %351 : vector<1x1x1x32xf32> to vector<1x32xf32>
    %cst_223 = arith.constant dense<0.000000e+00> : vector<8xf32>
    %353 = vector.multi_reduction <add>, %348, %cst_223 [1] : vector<8x32xf32> to vector<8xf32>
    %354 = vector.shape_cast %353 : vector<8xf32> to vector<8x1xf32>
    %cst_224 = arith.constant 3.200000e+01 : f32
    %355 = vector.broadcast %cst_224 : f32 to vector<8x1xf32>
    %356 = arith.divf %354, %355 : vector<8x1xf32>
    %357 = vector.broadcast %356 : vector<8x1xf32> to vector<8x32xf32>
    %358 = arith.subf %348, %357 : vector<8x32xf32>
    %359 = arith.mulf %358, %358 : vector<8x32xf32>
    %cst_225 = arith.constant dense<0.000000e+00> : vector<8xf32>
    %360 = vector.multi_reduction <add>, %359, %cst_225 [1] : vector<8x32xf32> to vector<8xf32>
    %361 = vector.shape_cast %360 : vector<8xf32> to vector<8x1xf32>
    %cst_226 = arith.constant 0.0322580636 : f32
    %362 = vector.broadcast %cst_226 : f32 to vector<8x1xf32>
    %363 = arith.mulf %361, %362 : vector<8x1xf32>
    %364 = math.sqrt %363 : vector<8x1xf32>
    %cst_227 = arith.constant 9.99999997E-7 : f32
    %365 = vector.broadcast %cst_227 : f32 to vector<8x1xf32>
    %366 = arith.addf %364, %365 : vector<8x1xf32>
    %cst_228 = arith.constant 1.000000e+00 : f32
    %367 = vector.broadcast %cst_228 : f32 to vector<8x1xf32>
    %368 = arith.divf %367, %366 : vector<8x1xf32>
    %369 = vector.broadcast %368 : vector<8x1xf32> to vector<8x32xf32>
    %370 = arith.mulf %358, %369 : vector<8x32xf32>
    %371 = vector.broadcast %350 : vector<1x32xf32> to vector<8x32xf32>
    %372 = arith.mulf %371, %370 : vector<8x32xf32>
    %373 = vector.broadcast %352 : vector<1x32xf32> to vector<8x32xf32>
    %374 = arith.addf %372, %373 : vector<8x32xf32>
    %c1_229 = arith.constant 1 : index
    %c0_230 = arith.constant 0 : index
    %c0_231 = arith.constant 0 : index
    %375 = vector.load %arg9[%c1_229, %c0_230, %c0_231] : memref<2x32x64xf32, #tpu.memory_space<vmem>>, vector<1x32x64xf32>
    %376 = vector.shape_cast %375 : vector<1x32x64xf32> to vector<32x64xf32>
    %cst_232 = arith.constant dense<0.000000e+00> : vector<8x64xf32>
    %377 = tpu.matmul %374, %376, %cst_232 {dimension_numbers = #tpu.dot_dimension_numbers<[1], [0], [0], [1], [0, 0, 1, 1], [], []>} : vector<8x32xf32>, vector<32x64xf32>, vector<8x64xf32> -> vector<8x64xf32>
    %c1_233 = arith.constant 1 : index
    %c0_234 = arith.constant 0 : index
    %c0_235 = arith.constant 0 : index
    %378 = vector.load %arg10[%c1_233, %c0_234, %c0_235] : memref<2x1x64xf32, #tpu.memory_space<vmem>>, vector<1x1x64xf32>
    %379 = vector.shape_cast %378 : vector<1x1x64xf32> to vector<1x64xf32>
    %380 = vector.broadcast %379 : vector<1x64xf32> to vector<8x64xf32>
    %381 = arith.addf %377, %380 : vector<8x64xf32>
    %cst_236 = arith.constant 0.000000e+00 : f32
    %382 = vector.broadcast %cst_236 : f32 to vector<8x64xf32>
    %383 = arith.maximumf %381, %382 : vector<8x64xf32>
    %c1_237 = arith.constant 1 : index
    %c0_238 = arith.constant 0 : index
    %c0_239 = arith.constant 0 : index
    %384 = vector.load %arg11[%c1_237, %c0_238, %c0_239] : memref<2x64x32xf32, #tpu.memory_space<vmem>>, vector<1x64x32xf32>
    %385 = vector.shape_cast %384 : vector<1x64x32xf32> to vector<64x32xf32>
    %cst_240 = arith.constant dense<0.000000e+00> : vector<8x32xf32>
    %386 = tpu.matmul %383, %385, %cst_240 {dimension_numbers = #tpu.dot_dimension_numbers<[1], [0], [0], [1], [0, 0, 1, 1], [], []>} : vector<8x64xf32>, vector<64x32xf32>, vector<8x32xf32> -> vector<8x32xf32>
    %387 = arith.addf %348, %386 : vector<8x32xf32>
    %c1_241 = arith.constant 1 : index
    %c0_242 = arith.constant 0 : index
    %c0_243 = arith.constant 0 : index
    %388 = vector.load %arg12[%c1_241, %c0_242, %c0_243] : memref<2x1x32xf32, #tpu.memory_space<vmem>>, vector<1x1x32xf32>
    %389 = vector.shape_cast %388 : vector<1x1x32xf32> to vector<1x32xf32>
    %390 = vector.broadcast %389 : vector<1x32xf32> to vector<8x32xf32>
    %391 = arith.addf %387, %390 : vector<8x32xf32>
    %c0_244 = arith.constant 0 : index
    %c0_245 = arith.constant 0 : index
    %392 = vector.load %arg13[%c0_244, %c0_245] : memref<1x32xf32, #tpu.memory_space<vmem>>, vector<1x32xf32>
    %c0_246 = arith.constant 0 : index
    %c0_247 = arith.constant 0 : index
    %393 = vector.load %arg14[%c0_246, %c0_247] : memref<1x32xf32, #tpu.memory_space<vmem>>, vector<1x32xf32>
    %cst_248 = arith.constant dense<0.000000e+00> : vector<8xf32>
    %394 = vector.multi_reduction <add>, %391, %cst_248 [1] : vector<8x32xf32> to vector<8xf32>
    %395 = vector.shape_cast %394 : vector<8xf32> to vector<8x1xf32>
    %cst_249 = arith.constant 3.200000e+01 : f32
    %396 = vector.broadcast %cst_249 : f32 to vector<8x1xf32>
    %397 = arith.divf %395, %396 : vector<8x1xf32>
    %398 = vector.broadcast %397 : vector<8x1xf32> to vector<8x32xf32>
    %399 = arith.subf %391, %398 : vector<8x32xf32>
    %400 = arith.mulf %399, %399 : vector<8x32xf32>
    %cst_250 = arith.constant dense<0.000000e+00> : vector<8xf32>
    %401 = vector.multi_reduction <add>, %400, %cst_250 [1] : vector<8x32xf32> to vector<8xf32>
    %402 = vector.shape_cast %401 : vector<8xf32> to vector<8x1xf32>
    %cst_251 = arith.constant 0.0322580636 : f32
    %403 = vector.broadcast %cst_251 : f32 to vector<8x1xf32>
    %404 = arith.mulf %402, %403 : vector<8x1xf32>
    %405 = math.sqrt %404 : vector<8x1xf32>
    %cst_252 = arith.constant 9.99999997E-7 : f32
    %406 = vector.broadcast %cst_252 : f32 to vector<8x1xf32>
    %407 = arith.addf %405, %406 : vector<8x1xf32>
    %cst_253 = arith.constant 1.000000e+00 : f32
    %408 = vector.broadcast %cst_253 : f32 to vector<8x1xf32>
    %409 = arith.divf %408, %407 : vector<8x1xf32>
    %410 = vector.broadcast %409 : vector<8x1xf32> to vector<8x32xf32>
    %411 = arith.mulf %399, %410 : vector<8x32xf32>
    %412 = vector.broadcast %392 : vector<1x32xf32> to vector<8x32xf32>
    %413 = arith.mulf %412, %411 : vector<8x32xf32>
    %414 = vector.broadcast %393 : vector<1x32xf32> to vector<8x32xf32>
    %415 = arith.addf %413, %414 : vector<8x32xf32>
    %c0_254 = arith.constant 0 : index
    %c0_255 = arith.constant 0 : index
    %c0_256 = arith.constant 0 : index
    %416 = vector.load %arg15[%c0_254, %c0_255, %c0_256] : memref<1x8x32xf32, #tpu.memory_space<vmem>>, vector<1x8x32xf32>
    %417 = vector.shape_cast %416 : vector<1x8x32xf32> to vector<8x32xf32>
    %418 = vector.shape_cast %415 : vector<8x32xf32> to vector<1x8x32xf32>
    tpu.vector_store %arg15[%c0_254, %c0_255, %c0_256], %418 {strides = array<i32>} : memref<1x8x32xf32, #tpu.memory_space<vmem>>, vector<1x8x32xf32>,
    return
  }
  func.func @transform_0(%arg0: i32) -> (i32, i32, i32) {
    %c0_i32 = arith.constant 0 : i32
    %c0_i32_0 = arith.constant 0 : i32
    %c0_i32_1 = arith.constant 0 : i32
    return %arg0, %c0_i32, %c0_i32_0 : i32, i32, i32
  }
  func.func @transform_1(%arg0: i32) -> (i32, i32, i32) {
    %c0_i32 = arith.constant 0 : i32
    %c0_i32_0 = arith.constant 0 : i32
    %c0_i32_1 = arith.constant 0 : i32
    return %arg0, %c0_i32, %c0_i32_0 : i32, i32, i32
  }
  func.func @transform_2(%arg0: i32) -> (i32, i32, i32) {
    %c0_i32 = arith.constant 0 : i32
    %c0_i32_0 = arith.constant 0 : i32
    %c0_i32_1 = arith.constant 0 : i32
    return %arg0, %c0_i32, %c0_i32_0 : i32, i32, i32
  }
  func.func @transform_3(%arg0: i32) -> (i32, i32, i32, i32) {
    %c0_i32 = arith.constant 0 : i32
    %c0_i32_0 = arith.constant 0 : i32
    %c0_i32_1 = arith.constant 0 : i32
    %c0_i32_2 = arith.constant 0 : i32
    %c0_i32_3 = arith.constant 0 : i32
    return %c0_i32, %c0_i32_0, %c0_i32_1, %c0_i32_2 : i32, i32, i32, i32
  }
  func.func @transform_4(%arg0: i32) -> (i32, i32, i32, i32) {
    %c0_i32 = arith.constant 0 : i32
    %c0_i32_0 = arith.constant 0 : i32
    %c0_i32_1 = arith.constant 0 : i32
    %c0_i32_2 = arith.constant 0 : i32
    %c0_i32_3 = arith.constant 0 : i32
    return %c0_i32, %c0_i32_0, %c0_i32_1, %c0_i32_2 : i32, i32, i32, i32
  }
  func.func @transform_5(%arg0: i32) -> (i32, i32, i32, i32) {
    %c0_i32 = arith.constant 0 : i32
    %c0_i32_0 = arith.constant 0 : i32
    %c0_i32_1 = arith.constant 0 : i32
    %c0_i32_2 = arith.constant 0 : i32
    %c0_i32_3 = arith.constant 0 : i32
    return %c0_i32, %c0_i32_0, %c0_i32_1, %c0_i32_2 : i32, i32, i32, i32
  }
  func.func @transform_6(%arg0: i32) -> (i32, i32, i32, i32) {
    %c0_i32 = arith.constant 0 : i32
    %c0_i32_0 = arith.constant 0 : i32
    %c0_i32_1 = arith.constant 0 : i32
    %c0_i32_2 = arith.constant 0 : i32
    %c0_i32_3 = arith.constant 0 : i32
    return %c0_i32, %c0_i32_0, %c0_i32_1, %c0_i32_2 : i32, i32, i32, i32
  }
  func.func @transform_7(%arg0: i32) -> (i32, i32, i32) {
    %c0_i32 = arith.constant 0 : i32
    %c0_i32_0 = arith.constant 0 : i32
    %c0_i32_1 = arith.constant 0 : i32
    %c0_i32_2 = arith.constant 0 : i32
    return %c0_i32, %c0_i32_0, %c0_i32_1 : i32, i32, i32
  }
  func.func @transform_8(%arg0: i32) -> (i32, i32, i32) {
    %c0_i32 = arith.constant 0 : i32
    %c0_i32_0 = arith.constant 0 : i32
    %c0_i32_1 = arith.constant 0 : i32
    %c0_i32_2 = arith.constant 0 : i32
    return %c0_i32, %c0_i32_0, %c0_i32_1 : i32, i32, i32
  }
  func.func @transform_9(%arg0: i32) -> (i32, i32, i32) {
    %c0_i32 = arith.constant 0 : i32
    %c0_i32_0 = arith.constant 0 : i32
    %c0_i32_1 = arith.constant 0 : i32
    %c0_i32_2 = arith.constant 0 : i32
    return %c0_i32, %c0_i32_0, %c0_i32_1 : i32, i32, i32
  }
  func.func @transform_10(%arg0: i32) -> (i32, i32, i32) {
    %c0_i32 = arith.constant 0 : i32
    %c0_i32_0 = arith.constant 0 : i32
    %c0_i32_1 = arith.constant 0 : i32
    %c0_i32_2 = arith.constant 0 : i32
    return %c0_i32, %c0_i32_0, %c0_i32_1 : i32, i32, i32
  }
  func.func @transform_11(%arg0: i32) -> (i32, i32, i32) {
    %c0_i32 = arith.constant 0 : i32
    %c0_i32_0 = arith.constant 0 : i32
    %c0_i32_1 = arith.constant 0 : i32
    %c0_i32_2 = arith.constant 0 : i32
    return %c0_i32, %c0_i32_0, %c0_i32_1 : i32, i32, i32
  }
  func.func @transform_12(%arg0: i32) -> (i32, i32) {
    %c0_i32 = arith.constant 0 : i32
    %c0_i32_0 = arith.constant 0 : i32
    %c0_i32_1 = arith.constant 0 : i32
    return %c0_i32, %c0_i32_0 : i32, i32
  }
  func.func @transform_13(%arg0: i32) -> (i32, i32) {
    %c0_i32 = arith.constant 0 : i32
    %c0_i32_0 = arith.constant 0 : i32
    %c0_i32_1 = arith.constant 0 : i32
    return %c0_i32, %c0_i32_0 : i32, i32
  }
  func.func @transform_14(%arg0: i32) -> (i32, i32, i32) {
    %c0_i32 = arith.constant 0 : i32
    %c0_i32_0 = arith.constant 0 : i32
    %c0_i32_1 = arith.constant 0 : i32
    return %arg0, %c0_i32, %c0_i32_0 : i32, i32, i32
  }
}

</mosaic_0001>

<bundles_post_ra>
// kernel: encoding_block_pallas.1
= control target key start
LH: loop header
LB: loop body
LE: loop exit
PB: predicated region body
PF: predicated region fallthrough
CT: control target
= control target key end

     0   :  { %s5102_s0 = inlined_call_operand.vmem [shape: f32[2,8,32], index: 0, kind: input, shape index: {}]   ;;  %s5103_s1 = inlined_call_operand.vmem [shape: f32[2,8,32], index: 1, kind: input, shape index: {}]   ;;  %s5104_s2 = inlined_call_operand.vmem [shape: f32[2,8,8], index: 2, kind: input, shape index: {}]   ;;  %s5105_s3 = inlined_call_operand.vmem [shape: f32[2,6,1,32], index: 3, kind: input, shape index: {}]   ;;  %s5106_s4 = inlined_call_operand.vmem [shape: f32[2,3,32,32], index: 4, kind: input, shape index: {}]   ;;  %s5107_s5 = inlined_call_operand.vmem [shape: f32[2,3,1,32], index: 5, kind: input, shape index: {}]   ;;  %s5108_s6 = inlined_call_operand.vmem [shape: f32[2,4,8,32], index: 6, kind: input, shape index: {}]   ;;  %s5109_s7 = inlined_call_operand.vmem [shape: f32[2,1,32], index: 7, kind: input, shape index: {}]   ;;  %s5110_s8 = inlined_call_operand.vmem [shape: f32[2,32,64], index: 8, kind: input, shape index: {}]   ;;  %s5111_s9 = inlined_call_operand.vmem [shape: f32[2,1,64], index: 9, kind: input, shape index: {}]   ;;  %s5112_s10 = inlined_call_operand.vmem [shape: f32[2,64,32], index: 10, kind: input, shape index: {}]   ;;  %s5113_s11 = inlined_call_operand.vmem [shape: f32[2,1,32], index: 11, kind: input, shape index: {}]   ;;  %s5114_s12 = inlined_call_operand.vmem [shape: f32[1,32], index: 12, kind: input, shape index: {}]   ;;  %s5115_s13 = inlined_call_operand.vmem [shape: f32[1,32], index: 13, kind: input, shape index: {}]   ;;  %s5116_s14 = inlined_call_operand.hbm [shape: f32[2,8,32], index: 14, kind: output, shape index: {}]  }
   0x1   :  { %5123 = sst [smem:[#allocation6_spill]] %s5102_s0 }
   0x2   :  { %5124 = sst [smem:[#allocation7_spill]] %s5103_s1 }
   0x3   :  { %5125 = sst [smem:[#allocation8_spill]] %s5104_s2 }
   0x4   :  { %5126 = sst [smem:[#allocation9_spill]] %s5105_s3 }
   0x5   :  { %19 = vsyncpa [#allocation3], 0 }
   0x6   :  { %21 = vsyncpa [#allocation3 + $0x1], 0  ;;  %s4456_s29 = smov 0   ;;  %s4458_s30 = smov 0  }
   0x7   :  { %s4460_s15 = smov 0   ;;  %s4462_s16 = smov 0  }
   0x8 LB: > { %s4477_s17 = sadd.s32 4294967295, %s4372_s16   ;;  %s3647_s18 = sadd.s32 4294967294, %s4372_s16   ;;  %s4372_s16 = sphi %s4462_s16, %s5141_s16   ;;  %s4368_s15 = sphi %s4460_s15, %s5140_s15   ;;  %s4364_s30 = sphi %s4458_s30, %s5139_s30   ;;  %s4360_s29 = sphi %s4456_s29, %s5138_s29  }
   0x9   : > { %s4481_s19 = sadd.s32 1, %s4372_s16   ;;  %s343_s20 = sadd.s32 1, %s4368_s15 }
   0xa   : > { %s340_s21 = ssub.s32 %s4372_s16, %s4481_s19  ;;  %p353_p0 = scmp.ne.s32.totalorder %s4368_s15, %s4364_s30 }
   0xb   : > { %p341_p1 = scmp.eq.s32.totalorder %s340_s21, 0  ;;  %p354_p2 = scmp.eq.s32.totalorder %s4477_s17, 1 }
   0xc   : > { %p359_p3 = scmp.ne.s32.totalorder %s4364_s30, %s4360_s29  ;;  %p360_p4 = scmp.eq.s32.totalorder %s3647_s18, 1 }
   0xd   : > { %s4492_s22 = scalar_select %p341_p1, %s4368_s15, %s343_s20  }
   0xe   : > { %p4494_p5 = por %p354_p2, %p353_p0  ;;  %p4498_p6 = por %p360_p4, %p359_p3 }
   0xf   : > { %5127 = sst [smem:[#allocation5_spill]] %s4492_s22  ;;  %p3650_p7 = scmp.ge.s32.totalorder %s4372_s16, 1 }
  0x10   : > { %p432_p8 = scmp.lt.s32.totalorder %s4372_s16, 3 }
  0x12   : > { %p433_p9 = pnand %p3650_p7, %p432_p8 }
  0x13   : > { %p485_p10 = scmp.lt.s32.totalorder (!%p433_p9), %s4477_s17, 1  ;;  %vm500_vm0 = vcmask (!%p433_p9), 261120   ;;  %s5130_s1 = sld [smem:[#allocation7_spill]] (!%p433_p9)  ;;  %v3664_v14 = vld [vmem:[%s5106_s4 + $0x20] sm:$0xff] (!%p433_p9)  ;;  %v3665_v15 = vld [vmem:[%s5106_s4 + $0x28] sm:$0xff] (!%p433_p9)  ;;  %v4374_v17 = vmov (!%p433_p9), 0.0|0.0  }
  0x14   : > { %436 = sbr.rel (%p433_p9) target bundleno = 7691 (0x1e0b), region = 76  ;;  %s5131_s0 = sld [smem:[#allocation6_spill]] (!%p433_p9)  ;;  %v579_v16 = vld [vmem:[%s5106_s4] sm:$0xff] (!%p433_p9)  ;;  %4143 = vmatprep.subr.bf16.mxu1 (!%p433_p9), %v4374_v17  ;;  %v4144_v18 = vpack.c.bf16 (!%p433_p9), %v3665_v15, %v3664_v14  ;;  %4137 = vmatprep.subr.bf16.mxu0 (!%p433_p9), %v4374_v17  ;;  %v580_v19 = vld [vmem:[%s5106_s4 + $0x8] sm:$0xff] (!%p433_p9)  ;;  %v3666_v20 = vld [vmem:[%s5106_s4 + $0x30] sm:$0xff] (!%p433_p9)  ;;  %vm4375_vm1 = vmmov (!%p433_p9), 0  }
  0x15   : > { %v3667_v21 = vld [vmem:[%s5106_s4 + $0x38] sm:$0xff] (!%p433_p9)  ;;  %v4138_v22 = vpack.c.bf16 (!%p433_p9), %v580_v19, %v579_v16  ;;  %v4376_v23 = vmov (!%p433_p9), 0.0   ;;  %v581_v24 = vld [vmem:[%s5106_s4 + $0x10] sm:$0xff] (!%p433_p9)  ;;  %s5132_s3 = sld [smem:[#allocation9_spill]] (!%p433_p9)  ;;  %v3671_v53 = vld [vmem:[%s5106_s4 + $0x40] sm:$0xff] (!%p433_p9)  ;;  %vm832_vm6 = vcmask (!%p433_p9), 64512  }
  0x16   : > { %3910 = vmatprep.mubr.msk.f32.mxu1 (!%p433_p9), %vm4375_vm1, %v4376_v23  ;;  %v582_v25 = vld [vmem:[%s5106_s4 + $0x18] sm:$0xff] (!%p433_p9)  ;;  %3899 = vmatprep.mubr.msk.f32.mxu0 (!%p433_p9), %vm4375_vm1, %v4376_v23  ;;  %v4147_v26 = vpack.c.bf16 (!%p433_p9), %v3667_v21, %v3666_v20  ;;  %v3672_v54 = vld [vmem:[%s5106_s4 + $0x48] sm:$0xff] (!%p433_p9)  ;;  %v3673_v59 = vld [vmem:[%s5106_s4 + $0x50] sm:$0xff] (!%p433_p9)  ;;  %s5133_s2 = sld [smem:[#allocation8_spill]] (!%p433_p9)  ;;  %s5117_s21 = smov (!%p433_p9), 104   ;;  %vm1931_vm9 = vcmask (!%p433_p9), 523264  }
  0x17   : > { %4145 = vmatpush3.bf16.msra.mxu1 (!%p433_p9), %v4144_v18  ;;  %4139 = vmatpush3.bf16.msra.mxu0 (!%p433_p9), %v4138_v22  ;;  %v4141_v27 = vpack.c.bf16 (!%p433_p9), %v582_v25, %v581_v24  ;;  %v4150_v57 = vpack.c.bf16 (!%p433_p9), %v3672_v54, %v3671_v53  ;;  %v3674_v60 = vld [vmem:[%s5106_s4 + $0x58] sm:$0xff] (!%p433_p9)  ;;  %v3669_v62 = vld [vmem:[%s5107_s5 + $0x1] ss:$0 sm:$0xff] (!%p433_p9)  ;;  %s5134_s27 = smov (!%p433_p9), 120   ;;  %s5135_s28 = smov (!%p433_p9), 112  }
  0x18   : > { %4146 = vmatprep.subr.bf16.mxu1 (!%p433_p9), %v4374_v17  ;;  %4140 = vmatprep.subr.bf16.mxu0 (!%p433_p9), %v4374_v17  ;;  %v4153_v61 = vpack.c.bf16 (!%p433_p9), %v3674_v60, %v3673_v59 }
  0x1b   : > { %s486_s25 = scalar_select %p485_p10, %s4477_s17, 1  ;;  %4148 = vmatpush3.bf16.msra.mxu1 %v4147_v26  ;;  %4142 = vmatpush3.bf16.msra.mxu0 %v4141_v27  ;;  %v3659_v45 = vld [vmem:[%s5132_s3 + $0x2] ss:$0 sm:$0xff]  ;;  %v3661_v47 = vld [vmem:[%s5132_s3 + $0x3] ss:$0 sm:$0xff] }
  0x1c   : > { %3929 = vmatprep.subr.mxu1 %v4376_v23  ;;  %4149 = vmatprep.subr.bf16.mxu0 %v4374_v17  ;;  %v3656_v50 = vld [vmem:[%s5132_s3] ss:$0 sm:$0xff]  ;;  %v3657_v55 = vld [vmem:[%s5132_s3 + $0x1] ss:$0 sm:$0xff] }
  0x1d   : > { %s4506_s26 = sshll.u32 %s486_s25, 3 }
  0x1e   : > { %s492_s18 = scalar_lea.vmem %s5130_s1, %s4506_s26  ;;  %s488_s22 = scalar_lea.vmem %s5131_s0, %s4506_s26 }
  0x1f   : > { %v498_v0 = vld [vmem:[%s492_s18] sm:$0xff]  ;;  %s5121_s18 = smov 120   ;;  %s496_s25 = scalar_lea.vmem %s5133_s2, %s4506_s26 }
  0x20   : > { %v501_v1 = vsel %vm500_vm0, %v498_v0, 0.0  ;;  %v4517_v2 = vld [vmem:[%s488_s22] sm:$0xff]  ;;  %s5119_s26 = smov 112   ;;  %s5136_s22 = smov 104  }
  0x21   : > { %502 = vadd.xlane.f32.xlu0 %v501_v1  ;;  %v526_v3 = vsel %vm500_vm0, %v4517_v2, 0.0 }
  0x25   : > { %527 = vadd.xlane.f32.xlu0 %v526_v3  ;;  %v3662_v3 = vld [vmem:[%s5107_s5] ss:$0 sm:$0xff] }
  0xae   : > { %v503_v4 = vpop.xlane.xlu0 %502 }
  0xaf   : > { %v505_v5 = vmul.f32 0.03125, %v503_v4 }
  0xb1   : > { %v4521_v6 = vsub.f32 %v498_v0, %v505_v5 }
  0xb2   : > { %v528_v7 = vpop.xlane.xlu0 %527 }
  0xb3   : > { %v529_v8 = vmul.f32 0.03125, %v528_v7  ;;  %v507_v9 = vmul.f32 %v4521_v6, %v4521_v6  ;;  %v3676_v7 = vld [vmem:[%s5107_s5 + $0x2] ss:$0 sm:$0xff] }
  0xb5   : > { %v4526_v10 = vsub.f32 %v4517_v2, %v529_v8  ;;  %v508_v11 = vsel %vm500_vm0, %v507_v9, 0.0 }
  0xb6   : > { %509 = vadd.xlane.f32.xlu1 %v508_v11 }
  0xb7   : > { %v531_v12 = vmul.f32 %v4526_v10, %v4526_v10 }
  0xb9   : > { %v532_v13 = vsel %vm500_vm0, %v531_v12, 0.0 }
  0xba   : > { %533 = vadd.xlane.f32.xlu1 %v532_v13  ;;  %v4643_v13 = vld [vmem:[%s496_s25] sm:$0xff] }
 0x143   : > { %v510_v28 = vpop.xlane.xlu1 %509 }
 0x144   : > { %v511_v29 = vmul.f32 0.032258064, %v510_v28 }
 0x146   : > { %4254 = vrsqrt.f32 %v511_v29  ;;  %vm514_vm2 = vcmp.eq.f32.partialorder %v511_v29, inf  ;;  %v517_v34 = vand.u32 2147483648, %v511_v29  ;;  %vm516_vm3 = vcmp.eq.f32.partialorder %v511_v29, 0.0 }
 0x147   : > { %v534_v30 = vpop.xlane.xlu1 %533 }
 0x148   : > { %v535_v31 = vmul.f32 0.032258064, %v534_v30 }
 0x14a   : > { %4256 = vrsqrt.f32 %v535_v31  ;;  %vm538_vm4 = vcmp.eq.f32.partialorder %v535_v31, inf  ;;  %v541_v40 = vand.u32 2147483648, %v535_v31  ;;  %vm540_vm5 = vcmp.eq.f32.partialorder %v535_v31, 0.0 }
 0x150   : > { %v4255_v32 = vpop.eup %4254 }
 0x151   : > { %v513_v33 = vmul.f32 %v4255_v32, %v511_v29 }
 0x153   : > { %v515_v35 = vsel %vm514_vm2, %v511_v29, %v513_v33 }
 0x154   : > { %v4257_v36 = vpop.eup %4256  ;;  %v518_v37 = vsel %vm516_vm3, %v517_v34, %v515_v35 }
 0x155   : > { %v519_v38 = vadd.f32 1e-06, %v518_v37  ;;  %v537_v39 = vmul.f32 %v4257_v36, %v535_v31 }
 0x157   : > { %4258 = vrcp.f32 %v519_v38  ;;  %v539_v41 = vsel %vm538_vm4, %v535_v31, %v537_v39  ;;  %v3684_v38 = vld [vmem:[%s5108_s6 + $0x8] sm:$0xff] }
 0x158   : > { %v542_v42 = vsel %vm540_vm5, %v541_v40, %v539_v41 }
 0x159   : > { %v543_v43 = vadd.f32 1e-06, %v542_v42  ;;  %v993_v42 = vld [vmem:[%s5108_s6] sm:$0xff] }
 0x15b   : > { %4260 = vrcp.f32 %v543_v43 }
 0x161   : > { %v4259_v44 = vpop.eup %4258 }
 0x162   : > { %v4570_v46 = vmul.f32 %v4259_v44, %v4521_v6 }
 0x164   : > { %v569_v48 = vmul.f32 %v3659_v45, %v4570_v46 }
 0x165   : > { %v4261_v49 = vpop.eup %4260 }
 0x166   : > { %v578_v51 = vadd.f32 %v3661_v47, %v569_v48  ;;  %v546_v52 = vmul.f32 %v4261_v49, %v4526_v10 }
 0x168   : > { %3911 = vmatmul.mubr.msk.f32.vlgmr.msra.gmra.mrb[0].mxu1 %vm500_vm0, %v578_v51  ;;  %v553_v56 = vmul.f32 %v3656_v50, %v546_v52 }
 0x169   : > { %3931 = vmatprep.mubr.msk.f32.mxu1 %vm4375_vm1, %v4376_v23 }
 0x16a   : > { %v560_v58 = vadd.f32 %v3657_v55, %v553_v56 }
 0x16c   : > { %3900 = vmatmul.mubr.msk.f32.vlgmr.msra.gmra.mrb[0].mxu0 %vm500_vm0, %v560_v58 }
 0x16d   : > { %4151 = vmatpush3.bf16.msra.mxu0 %v4150_v57  ;;  %3921 = vmatprep.mubr.msk.f32.mxu0 %vm4375_vm1, %v4376_v23 }
 0x16e   : > { %4152 = vmatprep.subr.bf16.mxu0 %v4374_v17 }
 0x171   : > { %4154 = vmatpush3.bf16.msra.mxu0 %v4153_v61 }
 0x172   : > { %3924 = vmatprep.subr.mxu0 %v4376_v23 }
 0x174   : > { %3922 = vmatmul.mubr.msk.f32.vlgmr.msra.gmra.mrb[2].mxu0 %vm500_vm0, %v578_v51 }
 0x175   : > { %3926 = vmatprep.mubr.msk.f32.mxu0 %vm4375_vm1, %v4376_v23 }
 0x23b   : > { %v745_v63 = vpop.f32.mrb[0].mxu1 }
 0x23c   : > { %v4609_v0 = vadd.f32 %v3669_v62, %v745_v63  ;;  %v3912_v1 = vpop.f32.mrb[1].mxu1 }
 0x23e   : > { %996 = vrot.lane.b32.xlu0 %v4609_v0, %s5121_s18  ;;  %3925 = vmatpush3.xpose.msk.msra.mxu0 %vm832_vm6, %v4609_v0 }
 0x23f   : > { %v659_v4 = vpop.f32.mrb[0].mxu0  ;;  %3934 = vmatprep.subr.mxu0 %v4376_v23 }
 0x240   : > { %v4619_v5 = vadd.f32 %v3662_v3, %v659_v4  ;;  %v3901_v6 = vpop.f32.mrb[1].mxu0 }
 0x242   : > { %994 = vrot.lane.b32.xlu1 %v4619_v5, %s5121_s18  ;;  %3927 = vmatmul.mubr.msk.f32.vlgmr.msra.gmra.mrb[4].mxu0 %vm832_vm6, %v4619_v5 }
 0x243   : > { %3936 = vmatprep.mubr.msk.f32.mxu0 %vm4375_vm1, %v4376_v23 }
 0x247   : > { %v828_v8 = vpop.f32.mrb[2].mxu0 }
 0x248   : > { %v4630_v9 = vadd.f32 %v3676_v7, %v828_v8  ;;  %v3923_v10 = vpop.f32.mrb[3].mxu0  ;;  %v3690_v7 = vld [vmem:[%s5108_s6 + $0x10] sm:$0xff] }
 0x24a   : > { %3930 = vmatpush3.msra.mxu1 %v4630_v9 }
 0x24b   : > { %3939 = vmatprep.subr.mxu1 %v4376_v23 }
 0x2b0   : > { %v997_v11 = vpop.permute.xlu0 %996 }
 0x2b1   : > { %3935 = vmatpush3.xpose.msk.msra.mxu0 %vm832_vm6, %v997_v11 }
 0x2b2   : > { %3944 = vmatprep.subr.mxu0 %v4376_v23 }
 0x2b4   : > { %v995_v12 = vpop.permute.xlu1 %994 }
 0x2b5   : > { %3937 = vmatmul.mubr.msk.f32.vlgmr.msra.gmra.mrb[6].mxu0 %vm832_vm6, %v995_v12 }
 0x2b6   : > { %3946 = vmatprep.mubr.msk.f32.mxu0 %vm4375_vm1, %v4376_v23  ;;  %3945 = vmatpush3.msra.mxu0 %v3684_v38 }
 0x2b7   : > { %3954 = vmatprep.subr.mxu0 %v4376_v23 }
 0x315   : > { %v905_v14 = vpop.f32.mrb[4].mxu0 }
 0x316   : > { %v906_v15 = vadd.f32 %v905_v14, %v4643_v13  ;;  %v3928_v16 = vpop.f32.mrb[5].mxu0 }
 0x318   : > { %v909_v18 = vsel %vm832_vm6, %v906_v15, -inf }
 0x319   : > { %910 = vmax.xlane.f32.xlu1 %v909_v18 }
 0x388   : > { %v1068_v19 = vpop.f32.mrb[6].mxu0 }
 0x389   : > { %v1069_v20 = vadd.f32 %v1068_v19, %v4643_v13  ;;  %v3938_v21 = vpop.f32.mrb[7].mxu0 }
 0x38b   : > { %v1072_v22 = vsel %vm832_vm6, %v1069_v20, -inf }
 0x38c   : > { %1073 = vmax.xlane.f32.xlu0 %v1072_v22 }
 0x3a6   : > { %v911_v24 = vpop.xlane.xlu1 %910 }
 0x3a7   : > { %v912_v25 = vsub.f32 %v906_v15, %v911_v24  ;;  %v3695_v24 = vld [vmem:[%s5108_s6 + $0x18] sm:$0xff] }
 0x3a9   : > { %v913_v26 = vmul.f32 1.442695, %v912_v25 }
 0x3ab   : > { %4262 = vpow2.f32 %v913_v26 }
 0x3b5   : > { %v4263_v27 = vpop.eup %4262 }
 0x3b6   : > { %v915_v28 = vsel %vm832_vm6, %v4263_v27, 0.0 }
 0x3b7   : > { %916 = vadd.xlane.f32.xlu0 %v915_v28 }
 0x3cd   : > { %1084 = vrot.lane.b32.xlu0 %v4630_v9, %s5121_s18 }
 0x419   : > { %v1074_v29 = vpop.xlane.xlu0 %1073 }
 0x41a   : > { %v1075_v30 = vsub.f32 %v1069_v20, %v1074_v29 }
 0x41c   : > { %v1076_v31 = vmul.f32 1.442695, %v1075_v30 }
 0x41e   : > { %4264 = vpow2.f32 %v1076_v31 }
 0x428   : > { %v4265_v32 = vpop.eup %4264 }
 0x429   : > { %v1078_v33 = vsel %vm832_vm6, %v4265_v32, 0.0 }
 0x42a   : > { %1079 = vadd.xlane.f32.xlu1 %v1078_v33 }
 0x43b   : > { %1310 = vrot.lane.b32.xlu1 %v4609_v0, %s5119_s26 }
 0x43f   : > { %1308 = vrot.lane.b32.xlu1 %v4619_v5, %s5119_s26 }
 0x444   : > { %v917_v34 = vpop.xlane.xlu0 %916 }
 0x445   : > { %4266 = vrcp.f32 %v917_v34 }
 0x448   : > { %v1085_v37 = vpop.permute.xlu0 %1084 }
 0x44f   : > { %v4267_v35 = vpop.eup %4266 }
 0x450   : > { %v919_v36 = vmul.f32 %v4267_v35, %v4263_v27  ;;  %v3697_v35 = vld [vmem:[%s5109_s7] ss:$0 sm:$0xff] }
 0x452   : > { %3932 = vmatmul.mubr.msk.f32.vlgmr.msra.gmra.mrb[2].mxu1 %vm832_vm6, %v919_v36 }
 0x453   : > { %3940 = vmatpush3.msra.mxu1 %v1085_v37  ;;  %3941 = vmatprep.mubr.msk.f32.mxu1 %vm4375_vm1, %v4376_v23 }
 0x454   : > { %3949 = vmatprep.subr.mxu1 %v4376_v23 }
 0x4b7   : > { %v1080_v39 = vpop.xlane.xlu1 %1079 }
 0x4b8   : > { %4268 = vrcp.f32 %v1080_v39 }
 0x4bb   : > { %v1311_v45 = vpop.permute.xlu1 %1310 }
 0x4bf   : > { %v1309_v49 = vpop.permute.xlu1 %1308 }
 0x4c2   : > { %v4269_v40 = vpop.eup %4268 }
 0x4c3   : > { %v1082_v41 = vmul.f32 %v4269_v40, %v4265_v32 }
 0x4c5   : > { %3942 = vmatmul.mubr.msk.f32.vlgmr.msra.gmra.mrb[4].mxu1 %vm832_vm6, %v1082_v41 }
 0x4c6   : > { %3950 = vmatpush3.msra.mxu1 %v993_v42  ;;  %3951 = vmatprep.mubr.msk.f32.mxu1 %vm4375_vm1, %v4376_v23 }
 0x4c7   : > { %3959 = vmatprep.subr.mxu1 %v4376_v23 }
 0x525   : > { %v989_v43 = vpop.f32.mrb[2].mxu1 }
 0x526   : > { %v3933_v44 = vpop.f32.mrb[3].mxu1  ;;  %3952 = vmatmul.mubr.msk.f32.vlgmr.msra.gmra.mrb[6].mxu1 %vm832_vm6, %v989_v43 }
 0x527   : > { %3961 = vmatprep.mubr.msk.f32.mxu1 %vm4375_vm1, %v4376_v23  ;;  %v1838_v44 = vld [vmem:[%s5110_s8] sm:$0xff] }
 0x598   : > { %v1156_v47 = vpop.f32.mrb[4].mxu1 }
 0x599   : > { %v3943_v48 = vpop.f32.mrb[5].mxu1  ;;  %3947 = vmatmul.mubr.msk.f32.vlgmr.msra.gmra.mrb[8].mxu0 %vm832_vm6, %v1156_v47 }
 0x59a   : > { %3955 = vmatpush3.xpose.msk.msra.mxu0 %vm832_vm6, %v1311_v45  ;;  %3956 = vmatprep.mubr.msk.f32.mxu0 %vm4375_vm1, %v4376_v23  ;;  %v1840_v45 = vld [vmem:[%s5110_s8 + $0x10] sm:$0xff]  ;;  %v1841_v48 = vld [vmem:[%s5110_s8 + $0x18] sm:$0xff] }
 0x59b   : > { %3964 = vmatprep.subr.mxu0 %v4376_v23 }
 0x59d   : > { %3957 = vmatmul.mubr.msk.f32.vlgmr.msra.gmra.mrb[10].mxu0 %vm832_vm6, %v1309_v49  ;;  %v4159_v49 = vpack.c.bf16 %v1841_v48, %v1840_v45  ;;  %v3715_v45 = vld [vmem:[%s5106_s4 + $0x68] sm:$0xff] }
 0x59e   : > { %3966 = vmatprep.mubr.msk.f32.mxu0 %vm4375_vm1, %v4376_v23  ;;  %3965 = vmatpush3.msra.mxu0 %v3690_v7  ;;  %v3701_v7 = vld [vmem:[%s5132_s3 + $0x5] ss:$0 sm:$0xff] }
 0x59f   : > { %3974 = vmatprep.subr.mxu0 %v4376_v23 }
 0x5f9   : > { %v1304_v50 = vpop.f32.mrb[6].mxu1 }
 0x5fa   : > { %v3953_v51 = vpop.f32.mrb[7].mxu1 }
 0x5fb   : > { %v1924_v51 = vld [vmem:[%s5112_s10 + $0x8] sm:$0xff] }
 0x66c   : > { %v1231_v52 = vpop.f32.mrb[8].mxu0 }
 0x66d   : > { %v1305_v53 = vadd.f32 %v1304_v50, %v1231_v52  ;;  %v3948_v54 = vpop.f32.mrb[9].mxu0  ;;  %v1923_v50 = vld [vmem:[%s5112_s10] sm:$0xff]  ;;  %v1925_v52 = vld [vmem:[%s5112_s10 + $0x10] sm:$0xff] }
 0x66e   : > { %v1926_v54 = vld [vmem:[%s5112_s10 + $0x18] sm:$0xff] }
 0x670   : > { %v1382_v55 = vpop.f32.mrb[10].mxu0 }
 0x671   : > { %v1383_v56 = vadd.f32 %v1382_v55, %v4643_v13  ;;  %v3958_v57 = vpop.f32.mrb[11].mxu0  ;;  %v4165_v55 = vpack.c.bf16 %v1926_v54, %v1925_v52 }
 0x672   : > { %v1928_v57 = vld [vmem:[%s5112_s10 + $0x28] sm:$0xff] }
 0x673   : > { %v1386_v58 = vsel %vm832_vm6, %v1383_v56, -inf }
 0x674   : > { %1387 = vmax.xlane.f32.xlu1 %v1386_v58 }
 0x685   : > { %1551 = vrot.lane.b32.xlu1 %v4609_v0, %s5117_s21 }
 0x689   : > { %1549 = vrot.lane.b32.xlu1 %v4619_v5, %s5117_s21 }
 0x701   : > { %v1388_v59 = vpop.xlane.xlu1 %1387 }
 0x702   : > { %v1389_v60 = vsub.f32 %v1383_v56, %v1388_v59  ;;  %v1927_v56 = vld [vmem:[%s5112_s10 + $0x20] sm:$0xff] }
 0x703   : > { %v4168_v58 = vpack.c.bf16 %v1928_v57, %v1927_v56 }
 0x704   : > { %v1390_v61 = vmul.f32 1.442695, %v1389_v60 }
 0x705   : > { %v1552_v4 = vpop.permute.xlu1 %1551 }
 0x706   : > { %4270 = vpow2.f32 %v1390_v61 }
 0x709   : > { %v1550_v6 = vpop.permute.xlu1 %1549 }
 0x710   : > { %v4271_v62 = vpop.eup %4270 }
 0x711   : > { %v1392_v63 = vsel %vm832_vm6, %v4271_v62, 0.0 }
 0x712   : > { %1393 = vadd.xlane.f32.xlu0 %v1392_v63 }
 0x728   : > { %1397 = vrot.lane.b32.xlu0 %v4630_v9, %s5119_s26 }
 0x79f   : > { %v1394_v1 = vpop.xlane.xlu0 %1393 }
 0x7a0   : > { %4272 = vrcp.f32 %v1394_v1 }
 0x7a3   : > { %v1398_v3 = vpop.permute.xlu0 %1397 }
 0x7a4   : > { %3960 = vmatpush3.msra.mxu1 %v1398_v3 }
 0x7a5   : > { %3969 = vmatprep.subr.mxu1 %v4376_v23 }
 0x7aa   : > { %v4273_v0 = vpop.eup %4272 }
 0x7ab   : > { %v1396_v5 = vmul.f32 %v4273_v0, %v4271_v62 }
 0x7ad   : > { %3962 = vmatmul.mubr.msk.f32.vlgmr.msra.gmra.mrb[8].mxu1 %vm832_vm6, %v1396_v5  ;;  %v3700_v5 = vld [vmem:[%s5132_s3 + $0x4] ss:$0 sm:$0xff] }
 0x7ae   : > { %3970 = vmatpush3.xpose.msk.msra.mxu1 %vm832_vm6, %v1552_v4  ;;  %3971 = vmatprep.mubr.msk.f32.mxu1 %vm4375_vm1, %v4376_v23 }
 0x7af   : > { %3979 = vmatprep.subr.mxu1 %v4376_v23 }
 0x7b1   : > { %3972 = vmatmul.mubr.msk.f32.vlgmr.msra.gmra.mrb[10].mxu1 %vm832_vm6, %v1550_v6 }
 0x7b2   : > { %3981 = vmatprep.mubr.msk.f32.mxu1 %vm4375_vm1, %v4376_v23  ;;  %3980 = vmatpush3.msra.mxu1 %v3695_v24 }
 0x7b3   : > { %4161 = vmatprep.subr.bf16.mxu1 %v4374_v17 }
 0x880   : > { %v1469_v8 = vpop.f32.mrb[8].mxu1 }
 0x881   : > { %v3963_v10 = vpop.f32.mrb[9].mxu1  ;;  %3967 = vmatmul.mubr.msk.f32.vlgmr.msra.gmra.mrb[12].mxu0 %vm832_vm6, %v1469_v8 }
 0x882   : > { %3976 = vmatprep.mubr.msk.f32.mxu0 %vm4375_vm1, %v4376_v23 }
 0x884   : > { %v1623_v11 = vpop.f32.mrb[10].mxu1 }
 0x885   : > { %v1624_v12 = vadd.f32 %v1623_v11, %v4643_v13  ;;  %v3973_v14 = vpop.f32.mrb[11].mxu1  ;;  %v1929_v11 = vld [vmem:[%s5112_s10 + $0x30] sm:$0xff] }
 0x887   : > { %v1627_v15 = vsel %vm832_vm6, %v1624_v12, -inf }
 0x888   : > { %1628 = vmax.xlane.f32.xlu0 %v1627_v15  ;;  %v3702_v15 = vld [vmem:[%s5111_s9] ss:$0 sm:$0xff] }
 0x89e   : > { %1638 = vrot.lane.b32.xlu0 %v4630_v9, %s5117_s21  ;;  %s482_s21 = sand.u32 1, %s4364_s30  }
 0x89f   : > { %s3551_s25 = scalar_lea.sflag [#allocation3], %s482_s21 }
 0x915   : > { %v1629_v16 = vpop.xlane.xlu0 %1628 }
 0x916   : > { %v1630_v18 = vsub.f32 %v1624_v12, %v1629_v16  ;;  %v1930_v12 = vld [vmem:[%s5112_s10 + $0x38] sm:$0xff]  ;;  %v3728_v16 = vld [vmem:[%s5106_s4 + $0xa0] sm:$0xff] }
 0x917   : > { %v4171_v14 = vpack.c.bf16 %v1930_v12, %v1929_v11 }
 0x918   : > { %v1631_v19 = vmul.f32 1.442695, %v1630_v18  ;;  %v3729_v18 = vld [vmem:[%s5106_s4 + $0xa8] sm:$0xff] }
 0x919   : > { %v1639_v20 = vpop.permute.xlu0 %1638 }
 0x91a   : > { %4274 = vpow2.f32 %v1631_v19  ;;  %3975 = vmatpush3.msra.mxu0 %v1639_v20 }
 0x91b   : > { %4155 = vmatprep.subr.bf16.mxu0 %v4374_v17 }
 0x924   : > { %v4275_v21 = vpop.eup %4274 }
 0x925   : > { %v1633_v22 = vsel %vm832_vm6, %v4275_v21, 0.0 }
 0x926   : > { %1634 = vadd.xlane.f32.xlu1 %v1633_v22  ;;  %v4186_v22 = vpack.c.bf16 %v3729_v18, %v3728_v16 }
 0x954   : > { %v1544_v9 = vpop.f32.mrb[12].mxu0 }
 0x955   : > { %v1548_v25 = vadd.f32 %v1544_v9, %v1305_v53  ;;  %v3968_v26 = vpop.f32.mrb[13].mxu0  ;;  %v4162_v53 = vpack.c.bf16 %v1924_v51, %v1923_v50  ;;  %v3730_v9 = vld [vmem:[%s5106_s4 + $0xb0] sm:$0xff] }
 0x956   : > { %v3711_v26 = vld [vmem:[%s5132_s3 + $0x8] ss:$0 sm:$0xff] }
 0x9b3   : > { %v1635_v27 = vpop.xlane.xlu1 %1634 }
 0x9b4   : > { %4276 = vrcp.f32 %v1635_v27 }
 0x9be   : > { %v4277_v28 = vpop.eup %4276 }
 0x9bf   : > { %v1637_v29 = vmul.f32 %v4277_v28, %v4275_v21  ;;  %v2061_v28 = vmul.f32 %v3711_v26, %v4570_v46  ;;  %v3705_v46 = vld [vmem:[%s5113_s11] ss:$0 sm:$0xff] }
 0x9c1   : > { %3977 = vmatmul.mubr.msk.f32.vlgmr.msra.gmra.mrb[14].mxu0 %vm832_vm6, %v1637_v29  ;;  %v3713_v29 = vld [vmem:[%s5132_s3 + $0x9] ss:$0 sm:$0xff] }
 0x9c2   : > { %3992 = vmatprep.mubr.msk.f32.mxu0 %vm4375_vm1, %v4376_v23 }
 0xa94   : > { %v1710_v30 = vpop.f32.mrb[14].mxu0 }
 0xa95   : > { %v3978_v31 = vpop.f32.mrb[15].mxu0  ;;  %3982 = vmatmul.mubr.msk.f32.vlgmr.msra.gmra.mrb[12].mxu1 %vm832_vm6, %v1710_v30  ;;  %v4811_v30 = vadd.f32 %v3713_v29, %v2061_v28 }
 0xa96   : > { %4011 = vmatprep.mubr.msk.f32.mxu1 %vm4375_vm1, %v4376_v23  ;;  %4163 = vmatpush3.bf16.msra.mxu1 %v4162_v53 }
 0xa97   : > { %4164 = vmatprep.subr.bf16.mxu1 %v4374_v17 }
 0xa9a   : > { %4166 = vmatpush3.bf16.msra.mxu1 %v4165_v55 }
 0xa9b   : > { %4167 = vmatprep.subr.bf16.mxu1 %v4374_v17 }
 0xa9e   : > { %4169 = vmatpush3.bf16.msra.mxu1 %v4168_v58 }
 0xa9f   : > { %4170 = vmatprep.subr.bf16.mxu1 %v4374_v17 }
 0xaa2   : > { %4172 = vmatpush3.bf16.msra.mxu1 %v4171_v14  ;;  %v3726_v14 = vld [vmem:[%s5107_s5 + $0x4] ss:$0 sm:$0xff] }
 0xaa3   : > { %4185 = vmatprep.subr.bf16.mxu1 %v4374_v17 }
 0xb68   : > { %v1785_v32 = vpop.f32.mrb[12].mxu1 }
 0xb69   : > { %v1789_v33 = vadd.f32 %v1785_v32, %v1548_v25  ;;  %v3983_v34 = vpop.f32.mrb[13].mxu1  ;;  %v3731_v25 = vld [vmem:[%s5106_s4 + $0xb8] sm:$0xff] }
 0xb6a   : > { %v4189_v27 = vpack.c.bf16 %v3731_v25, %v3730_v9 }
 0xb6b   : > { %v1790_v36 = vadd.f32 %v1789_v33, %v4517_v2  ;;  %v1839_v2 = vld [vmem:[%s5110_s8 + $0x8] sm:$0xff] }
 0xb6c   : > { %v4156_v47 = vpack.c.bf16 %v1839_v2, %v1838_v44  ;;  %v3714_v2 = vld [vmem:[%s5106_s4 + $0x60] sm:$0xff] }
 0xb6d   : > { %v4728_v37 = vadd.f32 %v3697_v35, %v1790_v36  ;;  %v3733_v36 = vld [vmem:[%s5107_s5 + $0x5] ss:$0 sm:$0xff]  ;;  %v4174_v48 = vpack.c.bf16 %v3715_v45, %v3714_v2 }
 0xb6e   : > { %4157 = vmatpush3.bf16.msra.mxu0 %v4156_v47  ;;  %v3716_v47 = vld [vmem:[%s5106_s4 + $0x70] sm:$0xff] }
 0xb6f   : > { %v1803_v38 = vsel %vm500_vm0, %v4728_v37, 0.0  ;;  %4158 = vmatprep.subr.bf16.mxu0 %v4374_v17 }
 0xb70   : > { %1804 = vadd.xlane.f32.xlu1 %v1803_v38 }
 0xb72   : > { %4160 = vmatpush3.bf16.msra.mxu0 %v4159_v49  ;;  %v3717_v49 = vld [vmem:[%s5106_s4 + $0x78] sm:$0xff] }
 0xb73   : > { %4173 = vmatprep.subr.bf16.mxu0 %v4374_v17  ;;  %v4177_v50 = vpack.c.bf16 %v3717_v49, %v3716_v47 }
 0xbfd   : > { %v1805_v39 = vpop.xlane.xlu1 %1804 }
 0xbfe   : > { %v1806_v40 = vmul.f32 0.03125, %v1805_v39 }
 0xc00   : > { %v1807_v41 = vsub.f32 %v4728_v37, %v1806_v40 }
 0xc02   : > { %v1808_v42 = vmul.f32 %v1807_v41, %v1807_v41 }
 0xc04   : > { %v1809_v43 = vsel %vm500_vm0, %v1808_v42, 0.0 }
 0xc05   : > { %1810 = vadd.xlane.f32.xlu1 %v1809_v43 }
 0xc92   : > { %v1811_v59 = vpop.xlane.xlu1 %1810 }
 0xc93   : > { %v1812_v60 = vmul.f32 0.032258064, %v1811_v59 }
 0xc95   : > { %4278 = vrsqrt.f32 %v1812_v60  ;;  %vm1815_vm7 = vcmp.eq.f32.partialorder %v1812_v60, inf  ;;  %v1818_v63 = vand.u32 2147483648, %v1812_v60  ;;  %vm1817_vm8 = vcmp.eq.f32.partialorder %v1812_v60, 0.0 }
 0xc9f   : > { %v4279_v61 = vpop.eup %4278 }
 0xca0   : > { %v1814_v62 = vmul.f32 %v4279_v61, %v1812_v60 }
 0xca2   : > { %v1816_v1 = vsel %vm1815_vm7, %v1812_v60, %v1814_v62  ;;  %v3708_v60 = vld [vmem:[%s5132_s3 + $0x6] ss:$0 sm:$0xff] }
 0xca3   : > { %v1819_v3 = vsel %vm1817_vm8, %v1818_v63, %v1816_v1  ;;  %v3721_v62 = vld [vmem:[%s5106_s4 + $0x80] sm:$0xff]  ;;  %v3722_v63 = vld [vmem:[%s5106_s4 + $0x88] sm:$0xff] }
 0xca4   : > { %v1820_v0 = vadd.f32 1e-06, %v1819_v3  ;;  %v3709_v1 = vld [vmem:[%s5132_s3 + $0x7] ss:$0 sm:$0xff] }
 0xca6   : > { %4280 = vrcp.f32 %v1820_v0  ;;  %v4180_v0 = vpack.c.bf16 %v3722_v63, %v3721_v62 }
 0xcb0   : > { %v4281_v4 = vpop.eup %4280 }
 0xcb1   : > { %v1823_v6 = vmul.f32 %v4281_v4, %v1807_v41 }
 0xcb3   : > { %v1830_v8 = vmul.f32 %v3700_v5, %v1823_v6  ;;  %v3723_v5 = vld [vmem:[%s5106_s4 + $0x90] sm:$0xff]  ;;  %v3724_v6 = vld [vmem:[%s5106_s4 + $0x98] sm:$0xff] }
 0xcb5   : > { %v1837_v10 = vadd.f32 %v3701_v7, %v1830_v8  ;;  %v4183_v7 = vpack.c.bf16 %v3724_v6, %v3723_v5  ;;  %v3719_v8 = vld [vmem:[%s5107_s5 + $0x3] ss:$0 sm:$0xff] }
 0xcb7   : > { %3993 = vmatmul.mubr.msk.f32.vlgmr.msra.gmra.mrb[16].mxu0 %vm500_vm0, %v1837_v10 }
 0xcb8   : > { %4022 = vmatprep.mubr.msk.f32.mxu0 %vm4375_vm1, %v4376_v23  ;;  %4175 = vmatpush3.bf16.msra.mxu0 %v4174_v48  ;;  %v3738_v48 = vld [vmem:[%s5108_s6 + $0x20] sm:$0xff] }
 0xcb9   : > { %4176 = vmatprep.subr.bf16.mxu0 %v4374_v17 }
 0xcbc   : > { %4178 = vmatpush3.bf16.msra.mxu0 %v4177_v50 }
 0xcbd   : > { %4179 = vmatprep.subr.bf16.mxu0 %v4374_v17 }
 0xd8a   : > { %v1918_v19 = vpop.f32.mrb[16].mxu0 }
 0xd8b   : > { %v1919_v20 = vadd.f32 %v3702_v15, %v1918_v19  ;;  %v3994_v21 = vpop.f32.mrb[17].mxu0 }
 0xd8d   : > { %v1922_v24 = vmax.f32 %v1919_v20, 0.0 }
 0xd8f   : > { %4012 = vmatmul.mubr.msk.f32.vlgmr.msra.gmra.mrb[14].mxu1 %vm1931_vm9, %v1922_v24 }
 0xd90   : > { %4187 = vmatpush3.bf16.msra.mxu1 %v4186_v22  ;;  %4044 = vmatprep.mubr.msk.f32.mxu1 %vm4375_vm1, %v4376_v23 }
 0xd91   : > { %4188 = vmatprep.subr.bf16.mxu1 %v4374_v17 }
 0xd94   : > { %4190 = vmatpush3.bf16.msra.mxu1 %v4189_v27 }
 0xd95   : > { %4052 = vmatprep.subr.mxu1 %v4376_v23 }
 0xd97   : > { %4045 = vmatmul.mubr.msk.f32.vlgmr.msra.gmra.mrb[16].mxu1 %vm500_vm0, %v4811_v30 }
 0xd98   : > { %4054 = vmatprep.mubr.msk.f32.mxu1 %vm4375_vm1, %v4376_v23 }
 0xe62   : > { %v2001_v31 = vpop.f32.mrb[14].mxu1 }
 0xe63   : > { %v2005_v32 = vadd.f32 %v2001_v31, %v4728_v37  ;;  %v4013_v33 = vpop.f32.mrb[15].mxu1 }
 0xe65   : > { %v4822_v34 = vadd.f32 %v3705_v46, %v2005_v32 }
 0xe67   : > { %v2018_v35 = vsel %vm500_vm0, %v4822_v34, 0.0 }
 0xe68   : > { %2019 = vadd.xlane.f32.xlu1 %v2018_v35 }
 0xe6a   : > { %v2322_v38 = vpop.f32.mrb[16].mxu1 }
 0xe6b   : > { %v4829_v39 = vadd.f32 %v3733_v36, %v2322_v38  ;;  %v4046_v40 = vpop.f32.mrb[17].mxu1 }
 0xe6d   : > { %4053 = vmatpush3.msra.mxu1 %v4829_v39 }
 0xe6e   : > { %4062 = vmatprep.subr.mxu1 %v4376_v23 }
 0xef5   : > { %v2020_v37 = vpop.xlane.xlu1 %2019 }
 0xef6   : > { %v2021_v41 = vmul.f32 0.03125, %v2020_v37 }
 0xef8   : > { %v2022_v42 = vsub.f32 %v4822_v34, %v2021_v41 }
 0xefa   : > { %v2023_v43 = vmul.f32 %v2022_v42, %v2022_v42 }
 0xefc   : > { %v2024_v44 = vsel %vm500_vm0, %v2023_v43, 0.0  ;;  %v3742_v43 = vld [vmem:[%s5108_s6 + $0x28] sm:$0xff] }
 0xefd   : > { %2025 = vadd.xlane.f32.xlu1 %v2024_v44 }
 0xf8a   : > { %v2026_v51 = vpop.xlane.xlu1 %2025 }
 0xf8b   : > { %v2027_v52 = vmul.f32 0.032258064, %v2026_v51 }
 0xf8d   : > { %4282 = vrsqrt.f32 %v2027_v52  ;;  %vm2030_vm10 = vcmp.eq.f32.partialorder %v2027_v52, inf  ;;  %v2033_v55 = vand.u32 2147483648, %v2027_v52  ;;  %vm2032_vm11 = vcmp.eq.f32.partialorder %v2027_v52, 0.0 }
 0xf97   : > { %v4283_v53 = vpop.eup %4282 }
 0xf98   : > { %v2029_v54 = vmul.f32 %v4283_v53, %v2027_v52 }
 0xf9a   : > { %v2031_v56 = vsel %vm2030_vm10, %v2027_v52, %v2029_v54 }
 0xf9b   : > { %v2034_v57 = vsel %vm2032_vm11, %v2033_v55, %v2031_v56 }
 0xf9c   : > { %v2035_v58 = vadd.f32 1e-06, %v2034_v57 }
 0xf9e   : > { %4284 = vrcp.f32 %v2035_v58 }
 0xfa8   : > { %v4285_v59 = vpop.eup %4284 }
 0xfa9   : > { %v2038_v61 = vmul.f32 %v4285_v59, %v2022_v42 }
 0xfab   : > { %v2045_v3 = vmul.f32 %v3708_v60, %v2038_v61 }
 0xfad   : > { %v2052_v4 = vadd.f32 %v3709_v1, %v2045_v3 }
 0xfaf   : > { %4023 = vmatmul.mubr.msk.f32.vlgmr.msra.gmra.mrb[18].mxu0 %vm500_vm0, %v2052_v4 }
 0xfb0   : > { %4181 = vmatpush3.bf16.msra.mxu0 %v4180_v0  ;;  %4033 = vmatprep.mubr.msk.f32.mxu0 %vm4375_vm1, %v4376_v23 }
 0xfb1   : > { %4182 = vmatprep.subr.bf16.mxu0 %v4374_v17 }
 0xfb4   : > { %4184 = vmatpush3.bf16.msra.mxu0 %v4183_v7 }
 0xfb5   : > { %4047 = vmatprep.subr.mxu0 %v4376_v23 }
 0xfb7   : > { %4034 = vmatmul.mubr.msk.f32.vlgmr.msra.gmra.mrb[20].mxu0 %vm500_vm0, %v4811_v30 }
 0xfb8   : > { %4049 = vmatprep.mubr.msk.f32.mxu0 %vm4375_vm1, %v4376_v23 }
0x1082   : > { %v2153_v10 = vpop.f32.mrb[18].mxu0 }
0x1083   : > { %v4879_v11 = vadd.f32 %v3719_v8, %v2153_v10  ;;  %v4024_v12 = vpop.f32.mrb[19].mxu0 }
0x1085   : > { %2488 = vrot.lane.b32.xlu1 %v4879_v11, %s5134_s27 }
0x108a   : > { %v2239_v15 = vpop.f32.mrb[20].mxu0 }
0x108b   : > { %v4886_v16 = vadd.f32 %v3726_v14, %v2239_v15  ;;  %v4035_v18 = vpop.f32.mrb[21].mxu0  ;;  %v3748_v14 = vld [vmem:[%s5108_s6 + $0x30] sm:$0xff] }
0x108d   : > { %2490 = vrot.lane.b32.xlu0 %v4886_v16, %s5134_s27  ;;  %4048 = vmatpush3.xpose.msk.msra.mxu0 %vm832_vm6, %v4886_v16 }
0x108e   : > { %4057 = vmatprep.subr.mxu0 %v4376_v23 }
0x1090   : > { %4050 = vmatmul.mubr.msk.f32.vlgmr.msra.gmra.mrb[22].mxu0 %vm832_vm6, %v4879_v11 }
0x1091   : > { %4059 = vmatprep.mubr.msk.f32.mxu0 %vm4375_vm1, %v4376_v23 }
0x10f7   : > { %v2489_v20 = vpop.permute.xlu1 %2488 }
0x10ff   : > { %v2491_v19 = vpop.permute.xlu0 %2490 }
0x1100   : > { %4058 = vmatpush3.xpose.msk.msra.mxu0 %vm832_vm6, %v2491_v19 }
0x1101   : > { %4067 = vmatprep.subr.mxu0 %v4376_v23 }
0x1103   : > { %4060 = vmatmul.mubr.msk.f32.vlgmr.msra.gmra.mrb[24].mxu0 %vm832_vm6, %v2489_v20 }
0x1104   : > { %4069 = vmatprep.mubr.msk.f32.mxu0 %vm4375_vm1, %v4376_v23  ;;  %4068 = vmatpush3.msra.mxu0 %v3742_v43 }
0x1105   : > { %4077 = vmatprep.subr.mxu0 %v4376_v23 }
0x1163   : > { %v2398_v21 = vpop.f32.mrb[22].mxu0 }
0x1164   : > { %v2399_v22 = vadd.f32 %v2398_v21, %v4643_v13  ;;  %v4051_v24 = vpop.f32.mrb[23].mxu0 }
0x1166   : > { %v2402_v9 = vsel %vm832_vm6, %v2399_v22, -inf }
0x1167   : > { %2403 = vmax.xlane.f32.xlu0 %v2402_v9 }
0x11d6   : > { %v2562_v25 = vpop.f32.mrb[24].mxu0 }
0x11d7   : > { %v2563_v26 = vadd.f32 %v2562_v25, %v4643_v13  ;;  %v4061_v27 = vpop.f32.mrb[25].mxu0 }
0x11d8   : > { %v3753_v27 = vld [vmem:[%s5108_s6 + $0x38] sm:$0xff] }
0x11d9   : > { %v2566_v28 = vsel %vm832_vm6, %v2563_v26, -inf }
0x11da   : > { %2567 = vmax.xlane.f32.xlu1 %v2566_v28 }
0x11eb   : > { %2804 = vrot.lane.b32.xlu1 %v4886_v16, %s5135_s28 }
0x11f4   : > { %v2404_v29 = vpop.xlane.xlu0 %2403 }
0x11f5   : > { %v2405_v30 = vsub.f32 %v2399_v22, %v2404_v29 }
0x11f7   : > { %v2406_v31 = vmul.f32 1.442695, %v2405_v30 }
0x11f9   : > { %4286 = vpow2.f32 %v2406_v31 }
0x1203   : > { %v4287_v46 = vpop.eup %4286 }
0x1204   : > { %v2408_v32 = vsel %vm832_vm6, %v4287_v46, 0.0 }
0x1205   : > { %2409 = vadd.xlane.f32.xlu0 %v2408_v32 }
0x1267   : > { %v2568_v33 = vpop.xlane.xlu1 %2567 }
0x1268   : > { %v2569_v35 = vsub.f32 %v2563_v26, %v2568_v33 }
0x126a   : > { %v2570_v36 = vmul.f32 1.442695, %v2569_v35 }
0x126b   : > { %v2805_v52 = vpop.permute.xlu1 %2804 }
0x126c   : > { %4288 = vpow2.f32 %v2570_v36 }
0x1276   : > { %v4289_v38 = vpop.eup %4288 }
0x1277   : > { %v2572_v40 = vsel %vm832_vm6, %v4289_v38, 0.0 }
0x1278   : > { %2573 = vadd.xlane.f32.xlu0 %v2572_v40  ;;  %v3756_v40 = vld [vmem:[%s5109_s7 + $0x1] ss:$0 sm:$0xff] }
0x128e   : > { %2578 = vrot.lane.b32.xlu0 %v4829_v39, %s5134_s27 }
0x1292   : > { %v2410_v37 = vpop.xlane.xlu0 %2409  ;;  %2802 = vrot.lane.b32.xlu0 %v4879_v11, %s5135_s28 }
0x1293   : > { %4290 = vrcp.f32 %v2410_v37 }
0x129d   : > { %v4291_v41 = vpop.eup %4290 }
0x129e   : > { %v2412_v42 = vmul.f32 %v4291_v41, %v4287_v46 }
0x12a0   : > { %4055 = vmatmul.mubr.msk.f32.vlgmr.msra.gmra.mrb[18].mxu1 %vm832_vm6, %v2412_v42 }
0x12a1   : > { %4064 = vmatprep.mubr.msk.f32.mxu1 %vm4375_vm1, %v4376_v23 }
0x1305   : > { %v2574_v44 = vpop.xlane.xlu0 %2573 }
0x1306   : > { %4292 = vrcp.f32 %v2574_v44 }
0x1309   : > { %v2579_v2 = vpop.permute.xlu0 %2578 }
0x130a   : > { %4063 = vmatpush3.msra.mxu1 %v2579_v2 }
0x130b   : > { %4072 = vmatprep.subr.mxu1 %v4376_v23 }
0x130d   : > { %v2803_v54 = vpop.permute.xlu0 %2802 }
0x1310   : > { %v4293_v45 = vpop.eup %4292 }
0x1311   : > { %v2576_v47 = vmul.f32 %v4293_v45, %v4289_v38 }
0x1313   : > { %4065 = vmatmul.mubr.msk.f32.vlgmr.msra.gmra.mrb[20].mxu1 %vm832_vm6, %v2576_v47  ;;  %v3761_v47 = vld [vmem:[%s5110_s8 + $0x20] sm:$0xff] }
0x1314   : > { %4073 = vmatpush3.msra.mxu1 %v3738_v48  ;;  %4074 = vmatprep.mubr.msk.f32.mxu1 %vm4375_vm1, %v4376_v23  ;;  %v3763_v48 = vld [vmem:[%s5110_s8 + $0x30] sm:$0xff] }
0x1315   : > { %4082 = vmatprep.subr.mxu1 %v4376_v23 }
0x1373   : > { %v2482_v49 = vpop.f32.mrb[18].mxu1 }
0x1374   : > { %v4056_v50 = vpop.f32.mrb[19].mxu1  ;;  %4075 = vmatmul.mubr.msk.f32.vlgmr.msra.gmra.mrb[22].mxu1 %vm832_vm6, %v2482_v49 }
0x1375   : > { %4084 = vmatprep.mubr.msk.f32.mxu1 %vm4375_vm1, %v4376_v23  ;;  %v3764_v50 = vld [vmem:[%s5110_s8 + $0x38] sm:$0xff] }
0x13e6   : > { %v2650_v51 = vpop.f32.mrb[20].mxu1 }
0x13e7   : > { %v4066_v53 = vpop.f32.mrb[21].mxu1  ;;  %4070 = vmatmul.mubr.msk.f32.vlgmr.msra.gmra.mrb[26].mxu0 %vm832_vm6, %v2650_v51  ;;  %v4195_v51 = vpack.c.bf16 %v3764_v50, %v3763_v48 }
0x13e8   : > { %4078 = vmatpush3.xpose.msk.msra.mxu0 %vm832_vm6, %v2805_v52  ;;  %4079 = vmatprep.mubr.msk.f32.mxu0 %vm4375_vm1, %v4376_v23  ;;  %v3768_v52 = vld [vmem:[%s5112_s10 + $0x40] sm:$0xff]  ;;  %v3769_v53 = vld [vmem:[%s5112_s10 + $0x48] sm:$0xff] }
0x13e9   : > { %4087 = vmatprep.subr.mxu0 %v4376_v23 }
0x13eb   : > { %4080 = vmatmul.mubr.msk.f32.vlgmr.msra.gmra.mrb[28].mxu0 %vm832_vm6, %v2803_v54  ;;  %v3770_v54 = vld [vmem:[%s5112_s10 + $0x50] sm:$0xff] }
0x13ec   : > { %4089 = vmatprep.mubr.msk.f32.mxu0 %vm4375_vm1, %v4376_v23  ;;  %4088 = vmatpush3.msra.mxu0 %v3748_v14  ;;  %v3775_v14 = vld [vmem:[%s5112_s10 + $0x78] sm:$0xff] }
0x13ed   : > { %4097 = vmatprep.subr.mxu0 %v4376_v23 }
0x1447   : > { %v2798_v55 = vpop.f32.mrb[22].mxu1 }
0x1448   : > { %v4076_v56 = vpop.f32.mrb[23].mxu1 }
0x1449   : > { %v3771_v56 = vld [vmem:[%s5112_s10 + $0x58] sm:$0xff] }
0x14ba   : > { %v2725_v57 = vpop.f32.mrb[26].mxu0 }
0x14bb   : > { %v2799_v58 = vadd.f32 %v2798_v55, %v2725_v57  ;;  %v4071_v59 = vpop.f32.mrb[27].mxu0  ;;  %v4198_v55 = vpack.c.bf16 %v3769_v53, %v3768_v52  ;;  %v4201_v57 = vpack.c.bf16 %v3771_v56, %v3770_v54 }
0x14bc   : > { %v3773_v59 = vld [vmem:[%s5112_s10 + $0x68] sm:$0xff] }
0x14be   : > { %v2876_v60 = vpop.f32.mrb[28].mxu0 }
0x14bf   : > { %v2877_v61 = vadd.f32 %v2876_v60, %v4643_v13  ;;  %v4081_v62 = vpop.f32.mrb[29].mxu0 }
0x14c1   : > { %v2880_v63 = vsel %vm832_vm6, %v2877_v61, -inf }
0x14c2   : > { %2881 = vmax.xlane.f32.xlu0 %v2880_v63 }
0x14d8   : > { %2891 = vrot.lane.b32.xlu0 %v4829_v39, %s5135_s28  ;;  %s3782_s28 = sshll.u32 %s4477_s17, 7  ;;  %s4380_s17 = smov [#allocation2]  }
0x14dc   : > { %3043 = vrot.lane.b32.xlu0 %v4879_v11, %s5136_s22 }
0x154f   : > { %v2882_v1 = vpop.xlane.xlu0 %2881 }
0x1550   : > { %v2883_v3 = vsub.f32 %v2877_v61, %v2882_v1 }
0x1552   : > { %v2884_v0 = vmul.f32 1.442695, %v2883_v3 }
0x1553   : > { %v2892_v4 = vpop.permute.xlu0 %2891 }
0x1554   : > { %4294 = vpow2.f32 %v2884_v0  ;;  %4083 = vmatpush3.msra.mxu1 %v2892_v4 }
0x1555   : > { %4092 = vmatprep.subr.mxu1 %v4376_v23 }
0x1557   : > { %v3044_v12 = vpop.permute.xlu0 %3043 }
0x155e   : > { %v4295_v5 = vpop.eup %4294 }
0x155f   : > { %v2886_v6 = vsel %vm832_vm6, %v4295_v5, 0.0 }
0x1560   : > { %2887 = vadd.xlane.f32.xlu1 %v2886_v6 }
0x1571   : > { %3045 = vrot.lane.b32.xlu1 %v4886_v16, %s5136_s22 }
0x15ed   : > { %v2888_v7 = vpop.xlane.xlu1 %2887 }
0x15ee   : > { %4296 = vrcp.f32 %v2888_v7  ;;  %v3759_v7 = vld [vmem:[%s5132_s3 + $0xa] ss:$0 sm:$0xff] }
0x15f1   : > { %v3046_v11 = vpop.permute.xlu1 %3045 }
0x15f8   : > { %v4297_v8 = vpop.eup %4296 }
0x15f9   : > { %v2890_v10 = vmul.f32 %v4297_v8, %v4295_v5 }
0x15fb   : > { %4085 = vmatmul.mubr.msk.f32.vlgmr.msra.gmra.mrb[24].mxu1 %vm832_vm6, %v2890_v10 }
0x15fc   : > { %4093 = vmatpush3.xpose.msk.msra.mxu1 %vm832_vm6, %v3046_v11  ;;  %4094 = vmatprep.mubr.msk.f32.mxu1 %vm4375_vm1, %v4376_v23 }
0x15fd   : > { %4102 = vmatprep.subr.mxu1 %v4376_v23 }
0x15ff   : > { %4095 = vmatmul.mubr.msk.f32.vlgmr.msra.gmra.mrb[26].mxu1 %vm832_vm6, %v3044_v12  ;;  %v3774_v12 = vld [vmem:[%s5112_s10 + $0x70] sm:$0xff] }
0x1600   : > { %4104 = vmatprep.mubr.msk.f32.mxu1 %vm4375_vm1, %v4376_v23  ;;  %4103 = vmatpush3.msra.mxu1 %v3753_v27 }
0x1601   : > { %4197 = vmatprep.subr.bf16.mxu1 %v4374_v17 }
0x16ce   : > { %v2963_v15 = vpop.f32.mrb[24].mxu1 }
0x16cf   : > { %v4086_v16 = vpop.f32.mrb[25].mxu1  ;;  %4090 = vmatmul.mubr.msk.f32.vlgmr.msra.gmra.mrb[30].mxu0 %vm832_vm6, %v2963_v15  ;;  %v4207_v15 = vpack.c.bf16 %v3775_v14, %v3774_v12 }
0x16d0   : > { %4099 = vmatprep.mubr.msk.f32.mxu0 %vm4375_vm1, %v4376_v23  ;;  %v3766_v16 = vld [vmem:[%s5111_s9 + $0x1] ss:$0 sm:$0xff] }
0x16d2   : > { %v3117_v18 = vpop.f32.mrb[26].mxu1 }
0x16d3   : > { %v3118_v19 = vadd.f32 %v3117_v18, %v4643_v13  ;;  %v4096_v20 = vpop.f32.mrb[27].mxu1 }
0x16d5   : > { %v3121_v21 = vsel %vm832_vm6, %v3118_v19, -inf }
0x16d6   : > { %3122 = vmax.xlane.f32.xlu1 %v3121_v21 }
0x1763   : > { %v3123_v22 = vpop.xlane.xlu1 %3122 }
0x1764   : > { %v3124_v24 = vsub.f32 %v3118_v19, %v3123_v22 }
0x1766   : > { %v3125_v9 = vmul.f32 1.442695, %v3124_v24  ;;  %v3778_v24 = vld [vmem:[%s5113_s11 + $0x1] ss:$0 sm:$0xff] }
0x1768   : > { %4298 = vpow2.f32 %v3125_v9 }
0x1772   : > { %v4299_v25 = vpop.eup %4298 }
0x1773   : > { %v3127_v26 = vsel %vm832_vm6, %v4299_v25, 0.0 }
0x1774   : > { %3128 = vadd.xlane.f32.xlu0 %v3127_v26 }
0x178a   : > { %3132 = vrot.lane.b32.xlu0 %v4829_v39, %s5136_s22  ;;  %s3651_s22 = sshll.u32 %s482_s21, 3 }
0x178b   : > { %s484_s20 = scalar_lea.vmem [#allocation2], %s3651_s22  ;;  %s4314_s22 = sshll.u32 %s4380_s17, 4  ;;  %s4315_s22 = int_to_ptr.vmem [resolvable:$false] %s4314_s22 }
0x178c   : > { %s3564_s0 = sshll.u32 %s484_s20, 4  ;;  %s4316_s18 = scalar_lea.vmem %s4315_s22, 256  ;;  %s5061_s0 = int_to_ptr.vmem [resolvable:$true] %s3564_s0 }
0x178d   : > { %s4310_s27 = scalar_lea.vmem %s5061_s0, 128  ;;  %p4317_p0 = scmp.lt.s32.totalorder %s5061_s0, %s4315_s22 }
0x178e   : > { %p4311_p11 = scmp.ne.s32.totalorder %s5061_s0, %s4310_s27  ;;  %p4318_p1 = scmp.lt.s32.totalorder %s4316_s18, %s4310_s27 }
0x1790   : > { %p4312_p12 = pnand %p4311_p11, %p4494_p5  ;;  %p4319_p2 = por %p4318_p1, %p4317_p0 }
0x1792   : > { %p4313_p13 = pneg %p4312_p12 }
0x1794   : > { %p4320_p3 = pnand %p4319_p2, %p4313_p13 }
0x17a2   : > { %v3038_v13 = vpop.f32.mrb[30].mxu0 }
0x17a3   : > { %v3042_v28 = vadd.f32 %v3038_v13, %v2799_v58  ;;  %v4091_v29 = vpop.f32.mrb[31].mxu0  ;;  %v3772_v58 = vld [vmem:[%s5112_s10 + $0x60] sm:$0xff] }
0x17a4   : > { %v4204_v60 = vpack.c.bf16 %v3773_v59, %v3772_v58 }
0x1801   : > { %v3129_v30 = vpop.xlane.xlu0 %3128 }
0x1802   : > { %4300 = vrcp.f32 %v3129_v30 }
0x1805   : > { %v3133_v31 = vpop.permute.xlu0 %3132 }
0x1806   : > { %4098 = vmatpush3.msra.mxu0 %v3133_v31 }
0x1807   : > { %4191 = vmatprep.subr.bf16.mxu0 %v4374_v17 }
0x180c   : > { %v4301_v46 = vpop.eup %4300 }
0x180d   : > { %v3131_v32 = vmul.f32 %v4301_v46, %v4299_v25 }
0x180f   : > { %4100 = vmatmul.mubr.msk.f32.vlgmr.msra.gmra.mrb[32].mxu0 %vm832_vm6, %v3131_v32 }
0x1810   : > { %4115 = vmatprep.mubr.msk.f32.mxu0 %vm4375_vm1, %v4376_v23 }
0x18e2   : > { %v3204_v39 = vpop.f32.mrb[32].mxu0 }
0x18e3   : > { %v4101_v33 = vpop.f32.mrb[33].mxu0  ;;  %4105 = vmatmul.mubr.msk.f32.vlgmr.msra.gmra.mrb[28].mxu1 %vm832_vm6, %v3204_v39 }
0x18e4   : > { %4134 = vmatprep.mubr.msk.f32.mxu1 %vm4375_vm1, %v4376_v23  ;;  %4199 = vmatpush3.bf16.msra.mxu1 %v4198_v55 }
0x18e5   : > { %4200 = vmatprep.subr.bf16.mxu1 %v4374_v17 }
0x18e8   : > { %4202 = vmatpush3.bf16.msra.mxu1 %v4201_v57 }
0x18e9   : > { %4203 = vmatprep.subr.bf16.mxu1 %v4374_v17 }
0x18ec   : > { %4205 = vmatpush3.bf16.msra.mxu1 %v4204_v60 }
0x18ed   : > { %4206 = vmatprep.subr.bf16.mxu1 %v4374_v17 }
0x18f0   : > { %4208 = vmatpush3.bf16.msra.mxu1 %v4207_v15 }
0x19b6   : > { %v3279_v35 = vpop.f32.mrb[28].mxu1 }
0x19b7   : > { %v3283_v36 = vadd.f32 %v3279_v35, %v3042_v28  ;;  %v4106_v38 = vpop.f32.mrb[29].mxu1 }
0x19b9   : > { %v3284_v37 = vadd.f32 %v3283_v36, %v4822_v34  ;;  %v3762_v34 = vld [vmem:[%s5110_s8 + $0x28] sm:$0xff] }
0x19ba   : > { %v4192_v49 = vpack.c.bf16 %v3762_v34, %v3761_v47 }
0x19bb   : > { %v4985_v41 = vadd.f32 %v3756_v40, %v3284_v37 }
0x19bc   : > { %4193 = vmatpush3.bf16.msra.mxu0 %v4192_v49 }
0x19bd   : > { %v3298_v42 = vsel %vm500_vm0, %v4985_v41, 0.0  ;;  %4194 = vmatprep.subr.bf16.mxu0 %v4374_v17  ;;  %v3760_v17 = vld [vmem:[%s5132_s3 + $0xb] ss:$0 sm:$0xff]  ;;  %s5059_s3 = scalar_lea.hbm %s5116_s14, %s3782_s28 }
0x19be   : > { %3299 = vadd.xlane.f32.xlu1 %v3298_v42 }
0x19c0   : > { %4196 = vmatpush3.bf16.msra.mxu0 %v4195_v51 }
0x1a4b   : > { %v3300_v43 = vpop.xlane.xlu1 %3299 }
0x1a4c   : > { %v3301_v44 = vmul.f32 0.03125, %v3300_v43  ;;  %v3780_v43 = vld [vmem:[%s5115_s13] ss:$0 sm:$0xff] }
0x1a4e   : > { %v3302_v2 = vsub.f32 %v4985_v41, %v3301_v44 }
0x1a50   : > { %v3303_v23 = vmul.f32 %v3302_v2, %v3302_v2 }
0x1a52   : > { %v3304_v45 = vsel %vm500_vm0, %v3303_v23, 0.0 }
0x1a53   : > { %3305 = vadd.xlane.f32.xlu1 %v3304_v45 }
0x1ae0   : > { %v3306_v61 = vpop.xlane.xlu1 %3305 }
0x1ae1   : > { %v3307_v62 = vmul.f32 0.032258064, %v3306_v61 }
0x1ae3   : > { %4302 = vrsqrt.f32 %v3307_v62  ;;  %vm3310_vm12 = vcmp.eq.f32.partialorder %v3307_v62, inf  ;;  %v3313_v3 = vand.u32 2147483648, %v3307_v62  ;;  %vm3312_vm13 = vcmp.eq.f32.partialorder %v3307_v62, 0.0 }
0x1aed   : > { %v4303_v63 = vpop.eup %4302 }
0x1aee   : > { %v3309_v1 = vmul.f32 %v4303_v63, %v3307_v62 }
0x1af0   : > { %v3311_v0 = vsel %vm3310_vm12, %v3307_v62, %v3309_v1 }
0x1af1   : > { %v3314_v4 = vsel %vm3312_vm13, %v3313_v3, %v3311_v0 }
0x1af2   : > { %v3315_v5 = vadd.f32 1e-06, %v3314_v4 }
0x1af4   : > { %4304 = vrcp.f32 %v3315_v5 }
0x1afe   : > { %v4305_v6 = vpop.eup %4304 }
0x1aff   : > { %v3318_v8 = vmul.f32 %v4305_v6, %v3302_v2 }
0x1b01   : > { %v3325_v10 = vmul.f32 %v3759_v7, %v3318_v8 }
0x1b03   : > { %v3332_v11 = vadd.f32 %v3760_v17, %v3325_v10 }
0x1b05   : > { %4116 = vmatmul.mubr.msk.f32.vlgmr.msra.gmra.mrb[34].mxu0 %vm500_vm0, %v3332_v11 }
0x1bd8   : > { %v3415_v18 = vpop.f32.mrb[34].mxu0 }
0x1bd9   : > { %v3416_v19 = vadd.f32 %v3766_v16, %v3415_v18  ;;  %v4117_v20 = vpop.f32.mrb[35].mxu0 }
0x1bdb   : > { %v3419_v21 = vmax.f32 %v3416_v19, 0.0 }
0x1bdd   : > { %4135 = vmatmul.mubr.msk.f32.vlgmr.msra.gmra.mrb[30].mxu1 %vm1931_vm9, %v3419_v21 }
0x1cb0   : > { %v3498_v22 = vpop.f32.mrb[30].mxu1 }
0x1cb1   : > { %v3502_v9 = vadd.f32 %v3498_v22, %v4985_v41  ;;  %v4136_v25 = vpop.f32.mrb[31].mxu1  ;;  %v3779_v41 = vld [vmem:[%s5114_s12] ss:$0 sm:$0xff] }
0x1cb3   : > { %v3511_v26 = vadd.f32 %v3778_v24, %v3502_v9 }
0x1cb5   : > { %v3514_v27 = vsel %vm500_vm0, %v3511_v26, 0.0 }
0x1cb6   : > { %3515 = vadd.xlane.f32.xlu1 %v3514_v27 }
0x1d43   : > { %v3516_v13 = vpop.xlane.xlu1 %3515 }
0x1d44   : > { %v3517_v28 = vmul.f32 0.03125, %v3516_v13 }
0x1d46   : > { %v3518_v29 = vsub.f32 %v3511_v26, %v3517_v28 }
0x1d48   : > { %v3519_v30 = vmul.f32 %v3518_v29, %v3518_v29 }
0x1d4a   : > { %v3520_v31 = vsel %vm500_vm0, %v3519_v30, 0.0 }
0x1d4b   : > { %3521 = vadd.xlane.f32.xlu1 %v3520_v31 }
0x1dd8   : > { %v3522_v46 = vpop.xlane.xlu1 %3521 }
0x1dd9   : > { %v3523_v32 = vmul.f32 0.032258064, %v3522_v46 }
0x1ddb   : > { %4306 = vrsqrt.f32 %v3523_v32  ;;  %vm3526_vm14 = vcmp.eq.f32.partialorder %v3523_v32, inf  ;;  %v3529_v35 = vand.u32 2147483648, %v3523_v32  ;;  %vm3528_vm15 = vcmp.eq.f32.partialorder %v3523_v32, 0.0 }
0x1de5   : > { %v4307_v39 = vpop.eup %4306 }
0x1de6   : > { %v3525_v33 = vmul.f32 %v4307_v39, %v3523_v32 }
0x1de8   : > { %v3527_v36 = vsel %vm3526_vm14, %v3523_v32, %v3525_v33 }
0x1de9   : > { %v3530_v38 = vsel %vm3528_vm15, %v3529_v35, %v3527_v36 }
0x1dea   : > { %v3531_v40 = vadd.f32 1e-06, %v3530_v38 }
0x1dec   : > { %4308 = vrcp.f32 %v3531_v40 }
0x1df6   : > { %v4309_v37 = vpop.eup %4308 }
0x1df7   : > { %v3534_v42 = vmul.f32 %v4309_v37, %v3518_v29 }
0x1df9   : > { %v3541_v44 = vmul.f32 %v3779_v41, %v3534_v42 }
0x1dfb   : > { %v3548_v2 = vadd.f32 %v3780_v43, %v3541_v44 }
0x1dfd   : > { %3549 = vst.msk [vmem:[%s484_s20] sm:$0xff] %vm500_vm0, %v3548_v2 }
0x1dfe   : > { %4323 = shalt.err (!%p4320_p3)
}
0x1dff   : > { %s4324_s2 = scalar_lea.hbm %s5059_s3, 128  ;;  %s4328_s28 = scalar_lea.hbm %s5116_s14, 256 }
0x1e00   : > { %p4325_p4 = scmp.ne.s32.totalorder %s5059_s3, %s4324_s2  ;;  %p4329_p9 = scmp.lt.u32.totalorder %s5059_s3, %s5116_s14 }
0x1e01   : > { %p4330_p10 = scmp.lt.u32.totalorder %s4328_s28, %s4324_s2  ;;  %p4332_p12 = scmp.lt.u32.totalorder %s4324_s2, %s5059_s3 }
0x1e02   : > { %p4326_p7 = pnand %p4325_p4, %p4494_p5 }
0x1e03   : > { %p4331_p11 = por %p4330_p10, %p4329_p9 }
0x1e04   : > { %p4327_p8 = pneg %p4326_p7 }
0x1e05   : > { %p4333_p13 = por %p4332_p12, %p4331_p11 }
0x1e07   : > { %p4334_p0 = pnand %p4333_p13, %p4327_p8 }
0x1e09   : > { %4337 = shalt.err (!%p4334_p0)
}
0x1e0a   : > { %4209 = dma.vmem_to_hbm [thread:$0]  (%p4494_p5), %s5061_s0, 128, %s5059_s3, %s3551_s25  }
0x1e0b PF: > { %p4215_p1 = scmp.ge.s32.totalorder %s4372_s16, 2  ;;  %s3576_s27 = sand.u32 1, %s4360_s29  }
0x1e0c   : > { %s3577_s17 = scalar_lea.sflag [#allocation3], %s3576_s27 }
0x1e0d   : > { %p4212_p2 = pnand %p4215_p1, %p4498_p6 }
0x1e0f   : > { %4355 = dma.done.wait (!%p4212_p2), %s3577_s17, 128  }
0x1e10   : > { %4357 = vsyncadd (!%p4212_p2), %s3577_s17, 4294967168  ;;  %s5137_s22 = sld [smem:[#allocation5_spill]]  ;;  %p24_p3 = scmp.ge.s32.totalorder %s4481_s19, 4  }
0x1e11   : > { %s5138_s29 = smov %s4364_s30  ;;  %s5139_s30 = smov %s4368_s15 }
0x1e12   : > { %s5141_s16 = smov %s4481_s19  ;;  %26 = sbr.rel (!%p24_p3) target bundleno = 8 (0x8), region = 150 }
0x1e16   : > { %s5140_s15 = smov %s5137_s22 }
0x1e19   :  { %3582 = vsyncpa [#allocation3], 1 }
0x1e1a   :  { %3584 = vsyncpa [#allocation3 + $0x1], 1 }

</bundles_post_ra>
